<compile_context>
chip_gen: v5e
topology: v5e:2x2
jax: 0.10.0
libtpu: 0.0.40
codegen_flags: <defaults>
</compile_context>

<pallas_src>
import functools

import jax
import jax.numpy as jnp
from jax import lax
from jax.experimental import pallas as pl
from jax.experimental.pallas import tpu as pltpu


# -----------------------------------------------------------------------------
# Pallas kernel: hoisted input projection + fused bidirectional recurrence + FC.
# Everything lives in VMEM (shapes are small); the time loop runs in-kernel.
# -----------------------------------------------------------------------------
def _bilstm_fc_kernel(
    x_ref,      # (T, Bp, 2E)  [x_t | x_{T-1-t}] time-major, batch padded
    wih_ref,    # (2E, 8H)     block-diag input->gates weights (both dirs)
    whh_ref,    # (2H, 8H)     block-diag hidden->gates weights (both dirs)
    b_ref,      # (1, 8H)      combined biases (b_ih + b_hh, both dirs)
    fcw_ref,    # (2H, Op)     final linear weights (row-blocks pre-swapped)
    fcb_ref,    # (1, Op)      final linear bias (lane padded)
    out_ref,    # (Bp, Op)     prediction slab
    gx_ref,     # scratch (T, Bp, 8H): precomputed input projections
):
    T, Bp, E2 = x_ref.shape
    H2, H8 = whh_ref.shape          # (2H, 8H)

    whh = whh_ref[...]              # hoisted: reused every timestep

    # --- (1) hoisted input projection: one big MXU matmul, biases folded in ---
    x_flat = x_ref[...].reshape(T * Bp, E2)
    gx = jnp.dot(x_flat, wih_ref[...], preferred_element_type=jnp.float32)
    gx = gx + b_ref[...]            # broadcast happens once, outside the loop
    gx_ref[...] = gx.reshape(T, Bp, H8)

    # --- (2) serial recurrence: one fused matmul + 2 EUP regions per step ---
    def step(t, carry):
        h, c = carry                                               # (Bp, 2H) each
        rec = jnp.dot(h, whh, preferred_element_type=jnp.float32)  # (Bp, 8H)
        gates = gx_ref[t] + rec
        # gate columns: [i_f, i_b, f_f, f_b, o_f, o_b, g_f, g_b]
        sig = jax.nn.sigmoid(gates[:, 0:3 * H2])                   # i, f, o gates
        g = jnp.tanh(gates[:, 3 * H2:4 * H2])                      # cell candidate
        i_g = sig[:, 0:H2]
        f_g = sig[:, H2:2 * H2]
        o_g = sig[:, 2 * H2:3 * H2]
        c_new = f_g * c + i_g * g
        h_new = o_g * jnp.tanh(c_new)
        return (h_new, c_new)

    zeros = jnp.zeros((Bp, H2), jnp.float32)
    h_fin, _ = lax.fori_loop(0, T, step, (zeros, zeros), unroll=True)

    # --- (3) final Linear into a lane-dense (Bp, 128) slab ---
    out_ref[...] = (
        jnp.dot(h_fin, fcw_ref[...], preferred_element_type=jnp.float32)
        + fcb_ref[...]
    )


# -----------------------------------------------------------------------------
# Weight repacking helpers (PyTorch layout -> fused kernel layout).
# PyTorch gate-row order is [i, f, g, o]; kernel gate-column order is
# [i_f, i_b, f_f, f_b, o_f, o_b, g_f, g_b] (sigmoid gates contiguous, tanh last).
# -----------------------------------------------------------------------------
def _gate_blocks_t(w, H):
    """(4H, X) PyTorch weight -> transposed blocks in [i, f, o, g] order."""
    return (w[0:H].T, w[H:2 * H].T, w[3 * H:4 * H].T, w[2 * H:3 * H].T)


def _interleave_blockdiag(w_f, w_b, H):
    """Build (Df+Db, 8H) block-diagonal weight with interleaved gate columns."""
    bf = _gate_blocks_t(w_f, H)
    bb = _gate_blocks_t(w_b, H)
    zf = jnp.zeros((w_f.shape[1], H), w_f.dtype)
    zb = jnp.zeros((w_b.shape[1], H), w_b.dtype)
    top = jnp.concatenate([bf[0], zf, bf[1], zf, bf[2], zf, bf[3], zf], axis=1)
    bot = jnp.concatenate([zb, bb[0], zb, bb[1], zb, bb[2], zb, bb[3]], axis=1)
    return jnp.concatenate([top, bot], axis=0)


def _pack_bias(b_f, b_b, H):
    """Per-direction combined biases (4H,) -> (1, 8H) interleaved row."""
    def blocks(b):
        return (b[0:H], b[H:2 * H], b[3 * H:4 * H], b[2 * H:3 * H])
    gf, gb = blocks(b_f), blocks(b_b)
    return jnp.concatenate(
        [gf[0], gb[0], gf[1], gb[1], gf[2], gb[2], gf[3], gb[3]])[None, :]


# -----------------------------------------------------------------------------
# Forward wrapper
# -----------------------------------------------------------------------------
@functools.partial(jax.jit, static_argnames=("output_dim",))
def lstm_forward(reviews, params, output_dim):
    """Embedding gather + weight repacking in XLA, then one pallas_call."""
    emb = params["embedding"]                      # (V, E), row 1 (pad) is zero
    H = params["weight_hh_f"].shape[1]
    B, T = reviews.shape
    O = output_dim

    # Embedding (dropout is identity in eval mode); time-major layout.
    x = jnp.transpose(emb[reviews], (1, 0, 2)).astype(jnp.float32)  # (T, B, E)

    # Pad batch to a sublane multiple so all per-step vregs are dense.
    Bp = ((B + 7) // 8) * 8
    x = jnp.pad(x, ((0, 0), (0, Bp - B), (0, 0)))

    # Forward reads time t, backward reads T-1-t: present both views side by
    # side along lanes so one block-diagonal matmul projects both directions.
    x_cat = jnp.concatenate([x, x[::-1]], axis=-1)                  # (T, Bp, 2E)

    wih_bd = _interleave_blockdiag(
        params["weight_ih_f"], params["weight_ih_b"], H)            # (2E, 8H)
    whh_bd = _interleave_blockdiag(
        params["weight_hh_f"], params["weight_hh_b"], H)            # (2H, 8H)
    b_cat = _pack_bias(params["bias_ih_f"] + params["bias_hh_f"],
                       params["bias_ih_b"] + params["bias_hh_b"], H)  # (1, 8H)

    # PyTorch concatenates [hidden[-1] (backward), hidden[-2] (forward)]; the
    # kernel carries h as [forward | backward], so swap the fc row-blocks.
    fc_w = params["fc_w"]                                           # (O, 2H)
    fcw = jnp.concatenate([fc_w[:, H:2 * H].T, fc_w[:, 0:H].T], axis=0)  # (2H, O)
    Op = ((O + 127) // 128) * 128                                   # lane-dense out
    fcw = jnp.pad(fcw, ((0, 0), (0, Op - O)))
    fcb = jnp.pad(params["fc_b"], (0, Op - O))[None, :]

    vmem = pl.BlockSpec(memory_space=pltpu.MemorySpace.VMEM)
    # Everything fits comfortably in VMEM at these shapes.  For production
    # T/B/E this should become a time-blocked grid (BlockSpec double-buffering,
    # batch-parallel axis for v7x's 2 TCs) with an explicit
    # pltpu.CompilerParams(vmem_limit_bytes=...).
    out = pl.pallas_call(
        _bilstm_fc_kernel,
        out_shape=jax.ShapeDtypeStruct((Bp, Op), jnp.float32),
        in_specs=[vmem] * 6,
        out_specs=vmem,
        scratch_shapes=[pltpu.VMEM((T, Bp, 8 * H), jnp.float32)],
    )(x_cat, wih_bd, whh_bd, b_cat, fcw, fcb)

    return out[:B, :O]


# -----------------------------------------------------------------------------
# Parameter init (PyTorch-native shapes/layout, matching nn.LSTM / nn.Linear)
# -----------------------------------------------------------------------------
def init_params(key, vocab_size, embedding_dim, hidden_dim, output_dim):
    ks = jax.random.split(key, 11)
    H, E, O, V = hidden_dim, embedding_dim, output_dim, vocab_size
    bound = 1.0 / (H ** 0.5)

    def unif(k, shape, b):
        return jax.random.uniform(k, shape, jnp.float32, -b, b)

    emb = jax.random.normal(ks[0], (V, E), jnp.float32)
    emb = emb.at[1].set(0.0)  # padding_idx=1

    fc_bound = 1.0 / ((2 * H) ** 0.5)
    return {
        "embedding": emb,
        "weight_ih_f": unif(ks[1], (4 * H, E), bound),
        "weight_hh_f": unif(ks[2], (4 * H, H), bound),
        "bias_ih_f": unif(ks[3], (4 * H,), bound),
        "bias_hh_f": unif(ks[4], (4 * H,), bound),
        "weight_ih_b": unif(ks[5], (4 * H, E), bound),
        "weight_hh_b": unif(ks[6], (4 * H, H), bound),
        "bias_ih_b": unif(ks[7], (4 * H,), bound),
        "bias_hh_b": unif(ks[8], (4 * H,), bound),
        "fc_w": unif(ks[9], (O, 2 * H), fc_bound),
        "fc_b": unif(ks[10], (O,), fc_bound),
    }


# -----------------------------------------------------------------------------
# Pure-JAX reference (PyTorch semantics) for a correctness check.
# -----------------------------------------------------------------------------
def _reference_forward(reviews, params, output_dim):
    H = params["weight_hh_f"].shape[1]
    x = params["embedding"][reviews]                       # (B, T, E)
    B, T, _ = x.shape

    def cell(x_t, h, c, wih, whh, bih, bhh):
        gates = x_t @ wih.T + h @ whh.T + bih + bhh        # (B, 4H), [i,f,g,o]
        i = jax.nn.sigmoid(gates[:, 0:H])
        f = jax.nn.sigmoid(gates[:, H:2 * H])
        g = jnp.tanh(gates[:, 2 * H:3 * H])
        o = jax.nn.sigmoid(gates[:, 3 * H:4 * H])
        c = f * c + i * g
        return o * jnp.tanh(c), c

    h_f = c_f = h_b = c_b = jnp.zeros((B, H), jnp.float32)
    for t in range(T):
        h_f, c_f = cell(x[:, t], h_f, c_f,
                        params["weight_ih_f"], params["weight_hh_f"],
                        params["bias_ih_f"], params["bias_hh_f"])
        h_b, c_b = cell(x[:, T - 1 - t], h_b, c_b,
                        params["weight_ih_b"], params["weight_hh_b"],
                        params["bias_ih_b"], params["bias_hh_b"])
    hidden = jnp.concatenate([h_b, h_f], axis=-1)  # [hidden[-1], hidden[-2]]
    return hidden @ params["fc_w"].T + params["fc_b"]


if __name__ == "__main__":
    # Module hyperparameters (layers=1, bidirectional=True, dropout inactive).
    vocab_size = 50
    embedding_dim = 32
    hidden_dim = 32
    output_dim = 5
    batch = 2
    seq_len = 8

    key = jax.random.PRNGKey(0)
    k_param, k_tok = jax.random.split(key)

    params = init_params(k_param, vocab_size, embedding_dim, hidden_dim, output_dim)
    reviews = jax.random.randint(k_tok, (batch, seq_len), 0, vocab_size, jnp.int32)

    pred = lstm_forward(reviews, params, output_dim)
    jax.block_until_ready(pred)
    assert pred.shape == (batch, output_dim)

    ref = _reference_forward(reviews, params, output_dim)
    assert bool(jnp.allclose(pred, ref, rtol=1e-2, atol=1e-2)), "mismatch vs reference"

    print("KERNEL_OK")
</pallas_src>

<mosaic_0001>
module attributes {stable_mosaic.version = 11 : i64} {
  func.func @_bilstm_fc_kernel(%arg0: memref<8x8x64xf32, #tpu.memory_space<vmem>>, %arg1: memref<64x256xf32, #tpu.memory_space<vmem>>, %arg2: memref<64x256xf32, #tpu.memory_space<vmem>>, %arg3: memref<1x256xf32, #tpu.memory_space<vmem>>, %arg4: memref<64x128xf32, #tpu.memory_space<vmem>>, %arg5: memref<1x128xf32, #tpu.memory_space<vmem>>, %arg6: memref<8x128xf32, #tpu.memory_space<vmem>>, %arg7: memref<8x8x256xf32, #tpu.memory_space<vmem>>) attributes {dimension_semantics = [], scalar_prefetch = 0 : i64, scratch_operands = 1 : i64, tpu.core_type = #tpu.core_type<tc>} {
    %c0 = arith.constant 0 : index
    %c0_0 = arith.constant 0 : index
    %0 = vector.load %arg2[%c0, %c0_0] : memref<64x256xf32, #tpu.memory_space<vmem>>, vector<64x256xf32>
    %c0_1 = arith.constant 0 : index
    %c0_2 = arith.constant 0 : index
    %c0_3 = arith.constant 0 : index
    %1 = vector.load %arg0[%c0_1, %c0_2, %c0_3] : memref<8x8x64xf32, #tpu.memory_space<vmem>>, vector<8x8x64xf32>
    %2 = vector.shape_cast %1 : vector<8x8x64xf32> to vector<64x64xf32>
    %c0_4 = arith.constant 0 : index
    %c0_5 = arith.constant 0 : index
    %3 = vector.load %arg1[%c0_4, %c0_5] : memref<64x256xf32, #tpu.memory_space<vmem>>, vector<64x256xf32>
    %cst = arith.constant dense<0.000000e+00> : vector<64x256xf32>
    %4 = tpu.matmul %2, %3, %cst {dimension_numbers = #tpu.dot_dimension_numbers<[1], [0], [0], [1], [0, 0, 1, 1], [], []>} : vector<64x64xf32>, vector<64x256xf32>, vector<64x256xf32> -> vector<64x256xf32>
    %c0_6 = arith.constant 0 : index
    %c0_7 = arith.constant 0 : index
    %5 = vector.load %arg3[%c0_6, %c0_7] : memref<1x256xf32, #tpu.memory_space<vmem>>, vector<1x256xf32>
    %6 = vector.broadcast %5 : vector<1x256xf32> to vector<64x256xf32>
    %7 = arith.addf %4, %6 : vector<64x256xf32>
    %8 = vector.shape_cast %7 : vector<64x256xf32> to vector<8x8x256xf32>
    %c0_8 = arith.constant 0 : index
    %c0_9 = arith.constant 0 : index
    %c0_10 = arith.constant 0 : index
    %9 = vector.load %arg7[%c0_8, %c0_9, %c0_10] : memref<8x8x256xf32, #tpu.memory_space<vmem>>, vector<8x8x256xf32>
    tpu.vector_store %arg7[%c0_8, %c0_9, %c0_10], %8 {strides = array<i32>} : memref<8x8x256xf32, #tpu.memory_space<vmem>>, vector<8x8x256xf32>,
    %cst_11 = arith.constant 0.000000e+00 : f32
    %10 = vector.broadcast %cst_11 : f32 to vector<8x64xf32>
    %c0_i32 = arith.constant 0 : i32
    %cst_12 = arith.constant dense<0.000000e+00> : vector<8x256xf32>
    %11 = tpu.matmul %10, %0, %cst_12 {dimension_numbers = #tpu.dot_dimension_numbers<[1], [0], [0], [1], [0, 0, 1, 1], [], []>} : vector<8x64xf32>, vector<64x256xf32>, vector<8x256xf32> -> vector<8x256xf32>
    %12 = arith.index_cast %c0_i32 : i32 to index
    %c0_13 = arith.constant 0 : index
    %c0_14 = arith.constant 0 : index
    %13 = vector.load %arg7[%12, %c0_13, %c0_14] : memref<8x8x256xf32, #tpu.memory_space<vmem>>, vector<1x8x256xf32>
    %14 = vector.shape_cast %13 : vector<1x8x256xf32> to vector<8x256xf32>
    %15 = arith.addf %14, %11 : vector<8x256xf32>
    %16 = vector.extract_strided_slice %15 {offsets = [0, 0], sizes = [8, 192], strides = [1, 1]} : vector<8x256xf32> to vector<8x192xf32>
    %17 = arith.negf %16 : vector<8x192xf32>
    %18 = math.exp %17 : vector<8x192xf32>
    %cst_15 = arith.constant 1.000000e+00 : f32
    %19 = vector.broadcast %cst_15 : f32 to vector<8x192xf32>
    %20 = arith.addf %19, %18 : vector<8x192xf32>
    %21 = arith.divf %19, %20 : vector<8x192xf32>
    %22 = vector.extract_strided_slice %15 {offsets = [0, 192], sizes = [8, 64], strides = [1, 1]} : vector<8x256xf32> to vector<8x64xf32>
    %23 = math.tanh %22 : vector<8x64xf32>
    %24 = vector.extract_strided_slice %21 {offsets = [0, 0], sizes = [8, 64], strides = [1, 1]} : vector<8x192xf32> to vector<8x64xf32>
    %25 = vector.extract_strided_slice %21 {offsets = [0, 64], sizes = [8, 64], strides = [1, 1]} : vector<8x192xf32> to vector<8x64xf32>
    %26 = vector.extract_strided_slice %21 {offsets = [0, 128], sizes = [8, 64], strides = [1, 1]} : vector<8x192xf32> to vector<8x64xf32>
    %27 = arith.mulf %25, %10 : vector<8x64xf32>
    %28 = arith.mulf %24, %23 : vector<8x64xf32>
    %29 = arith.addf %27, %28 : vector<8x64xf32>
    %30 = math.tanh %29 : vector<8x64xf32>
    %31 = arith.mulf %26, %30 : vector<8x64xf32>
    %c1_i32 = arith.constant 1 : i32
    %cst_16 = arith.constant dense<0.000000e+00> : vector<8x256xf32>
    %32 = tpu.matmul %31, %0, %cst_16 {dimension_numbers = #tpu.dot_dimension_numbers<[1], [0], [0], [1], [0, 0, 1, 1], [], []>} : vector<8x64xf32>, vector<64x256xf32>, vector<8x256xf32> -> vector<8x256xf32>
    %33 = arith.index_cast %c1_i32 : i32 to index
    %c0_17 = arith.constant 0 : index
    %c0_18 = arith.constant 0 : index
    %34 = vector.load %arg7[%33, %c0_17, %c0_18] : memref<8x8x256xf32, #tpu.memory_space<vmem>>, vector<1x8x256xf32>
    %35 = vector.shape_cast %34 : vector<1x8x256xf32> to vector<8x256xf32>
    %36 = arith.addf %35, %32 : vector<8x256xf32>
    %37 = vector.extract_strided_slice %36 {offsets = [0, 0], sizes = [8, 192], strides = [1, 1]} : vector<8x256xf32> to vector<8x192xf32>
    %38 = arith.negf %37 : vector<8x192xf32>
    %39 = math.exp %38 : vector<8x192xf32>
    %cst_19 = arith.constant 1.000000e+00 : f32
    %40 = vector.broadcast %cst_19 : f32 to vector<8x192xf32>
    %41 = arith.addf %40, %39 : vector<8x192xf32>
    %42 = arith.divf %40, %41 : vector<8x192xf32>
    %43 = vector.extract_strided_slice %36 {offsets = [0, 192], sizes = [8, 64], strides = [1, 1]} : vector<8x256xf32> to vector<8x64xf32>
    %44 = math.tanh %43 : vector<8x64xf32>
    %45 = vector.extract_strided_slice %42 {offsets = [0, 0], sizes = [8, 64], strides = [1, 1]} : vector<8x192xf32> to vector<8x64xf32>
    %46 = vector.extract_strided_slice %42 {offsets = [0, 64], sizes = [8, 64], strides = [1, 1]} : vector<8x192xf32> to vector<8x64xf32>
    %47 = vector.extract_strided_slice %42 {offsets = [0, 128], sizes = [8, 64], strides = [1, 1]} : vector<8x192xf32> to vector<8x64xf32>
    %48 = arith.mulf %46, %29 : vector<8x64xf32>
    %49 = arith.mulf %45, %44 : vector<8x64xf32>
    %50 = arith.addf %48, %49 : vector<8x64xf32>
    %51 = math.tanh %50 : vector<8x64xf32>
    %52 = arith.mulf %47, %51 : vector<8x64xf32>
    %c2_i32 = arith.constant 2 : i32
    %cst_20 = arith.constant dense<0.000000e+00> : vector<8x256xf32>
    %53 = tpu.matmul %52, %0, %cst_20 {dimension_numbers = #tpu.dot_dimension_numbers<[1], [0], [0], [1], [0, 0, 1, 1], [], []>} : vector<8x64xf32>, vector<64x256xf32>, vector<8x256xf32> -> vector<8x256xf32>
    %54 = arith.index_cast %c2_i32 : i32 to index
    %c0_21 = arith.constant 0 : index
    %c0_22 = arith.constant 0 : index
    %55 = vector.load %arg7[%54, %c0_21, %c0_22] : memref<8x8x256xf32, #tpu.memory_space<vmem>>, vector<1x8x256xf32>
    %56 = vector.shape_cast %55 : vector<1x8x256xf32> to vector<8x256xf32>
    %57 = arith.addf %56, %53 : vector<8x256xf32>
    %58 = vector.extract_strided_slice %57 {offsets = [0, 0], sizes = [8, 192], strides = [1, 1]} : vector<8x256xf32> to vector<8x192xf32>
    %59 = arith.negf %58 : vector<8x192xf32>
    %60 = math.exp %59 : vector<8x192xf32>
    %cst_23 = arith.constant 1.000000e+00 : f32
    %61 = vector.broadcast %cst_23 : f32 to vector<8x192xf32>
    %62 = arith.addf %61, %60 : vector<8x192xf32>
    %63 = arith.divf %61, %62 : vector<8x192xf32>
    %64 = vector.extract_strided_slice %57 {offsets = [0, 192], sizes = [8, 64], strides = [1, 1]} : vector<8x256xf32> to vector<8x64xf32>
    %65 = math.tanh %64 : vector<8x64xf32>
    %66 = vector.extract_strided_slice %63 {offsets = [0, 0], sizes = [8, 64], strides = [1, 1]} : vector<8x192xf32> to vector<8x64xf32>
    %67 = vector.extract_strided_slice %63 {offsets = [0, 64], sizes = [8, 64], strides = [1, 1]} : vector<8x192xf32> to vector<8x64xf32>
    %68 = vector.extract_strided_slice %63 {offsets = [0, 128], sizes = [8, 64], strides = [1, 1]} : vector<8x192xf32> to vector<8x64xf32>
    %69 = arith.mulf %67, %50 : vector<8x64xf32>
    %70 = arith.mulf %66, %65 : vector<8x64xf32>
    %71 = arith.addf %69, %70 : vector<8x64xf32>
    %72 = math.tanh %71 : vector<8x64xf32>
    %73 = arith.mulf %68, %72 : vector<8x64xf32>
    %c3_i32 = arith.constant 3 : i32
    %cst_24 = arith.constant dense<0.000000e+00> : vector<8x256xf32>
    %74 = tpu.matmul %73, %0, %cst_24 {dimension_numbers = #tpu.dot_dimension_numbers<[1], [0], [0], [1], [0, 0, 1, 1], [], []>} : vector<8x64xf32>, vector<64x256xf32>, vector<8x256xf32> -> vector<8x256xf32>
    %75 = arith.index_cast %c3_i32 : i32 to index
    %c0_25 = arith.constant 0 : index
    %c0_26 = arith.constant 0 : index
    %76 = vector.load %arg7[%75, %c0_25, %c0_26] : memref<8x8x256xf32, #tpu.memory_space<vmem>>, vector<1x8x256xf32>
    %77 = vector.shape_cast %76 : vector<1x8x256xf32> to vector<8x256xf32>
    %78 = arith.addf %77, %74 : vector<8x256xf32>
    %79 = vector.extract_strided_slice %78 {offsets = [0, 0], sizes = [8, 192], strides = [1, 1]} : vector<8x256xf32> to vector<8x192xf32>
    %80 = arith.negf %79 : vector<8x192xf32>
    %81 = math.exp %80 : vector<8x192xf32>
    %cst_27 = arith.constant 1.000000e+00 : f32
    %82 = vector.broadcast %cst_27 : f32 to vector<8x192xf32>
    %83 = arith.addf %82, %81 : vector<8x192xf32>
    %84 = arith.divf %82, %83 : vector<8x192xf32>
    %85 = vector.extract_strided_slice %78 {offsets = [0, 192], sizes = [8, 64], strides = [1, 1]} : vector<8x256xf32> to vector<8x64xf32>
    %86 = math.tanh %85 : vector<8x64xf32>
    %87 = vector.extract_strided_slice %84 {offsets = [0, 0], sizes = [8, 64], strides = [1, 1]} : vector<8x192xf32> to vector<8x64xf32>
    %88 = vector.extract_strided_slice %84 {offsets = [0, 64], sizes = [8, 64], strides = [1, 1]} : vector<8x192xf32> to vector<8x64xf32>
    %89 = vector.extract_strided_slice %84 {offsets = [0, 128], sizes = [8, 64], strides = [1, 1]} : vector<8x192xf32> to vector<8x64xf32>
    %90 = arith.mulf %88, %71 : vector<8x64xf32>
    %91 = arith.mulf %87, %86 : vector<8x64xf32>
    %92 = arith.addf %90, %91 : vector<8x64xf32>
    %93 = math.tanh %92 : vector<8x64xf32>
    %94 = arith.mulf %89, %93 : vector<8x64xf32>
    %c4_i32 = arith.constant 4 : i32
    %cst_28 = arith.constant dense<0.000000e+00> : vector<8x256xf32>
    %95 = tpu.matmul %94, %0, %cst_28 {dimension_numbers = #tpu.dot_dimension_numbers<[1], [0], [0], [1], [0, 0, 1, 1], [], []>} : vector<8x64xf32>, vector<64x256xf32>, vector<8x256xf32> -> vector<8x256xf32>
    %96 = arith.index_cast %c4_i32 : i32 to index
    %c0_29 = arith.constant 0 : index
    %c0_30 = arith.constant 0 : index
    %97 = vector.load %arg7[%96, %c0_29, %c0_30] : memref<8x8x256xf32, #tpu.memory_space<vmem>>, vector<1x8x256xf32>
    %98 = vector.shape_cast %97 : vector<1x8x256xf32> to vector<8x256xf32>
    %99 = arith.addf %98, %95 : vector<8x256xf32>
    %100 = vector.extract_strided_slice %99 {offsets = [0, 0], sizes = [8, 192], strides = [1, 1]} : vector<8x256xf32> to vector<8x192xf32>
    %101 = arith.negf %100 : vector<8x192xf32>
    %102 = math.exp %101 : vector<8x192xf32>
    %cst_31 = arith.constant 1.000000e+00 : f32
    %103 = vector.broadcast %cst_31 : f32 to vector<8x192xf32>
    %104 = arith.addf %103, %102 : vector<8x192xf32>
    %105 = arith.divf %103, %104 : vector<8x192xf32>
    %106 = vector.extract_strided_slice %99 {offsets = [0, 192], sizes = [8, 64], strides = [1, 1]} : vector<8x256xf32> to vector<8x64xf32>
    %107 = math.tanh %106 : vector<8x64xf32>
    %108 = vector.extract_strided_slice %105 {offsets = [0, 0], sizes = [8, 64], strides = [1, 1]} : vector<8x192xf32> to vector<8x64xf32>
    %109 = vector.extract_strided_slice %105 {offsets = [0, 64], sizes = [8, 64], strides = [1, 1]} : vector<8x192xf32> to vector<8x64xf32>
    %110 = vector.extract_strided_slice %105 {offsets = [0, 128], sizes = [8, 64], strides = [1, 1]} : vector<8x192xf32> to vector<8x64xf32>
    %111 = arith.mulf %109, %92 : vector<8x64xf32>
    %112 = arith.mulf %108, %107 : vector<8x64xf32>
    %113 = arith.addf %111, %112 : vector<8x64xf32>
    %114 = math.tanh %113 : vector<8x64xf32>
    %115 = arith.mulf %110, %114 : vector<8x64xf32>
    %c5_i32 = arith.constant 5 : i32
    %cst_32 = arith.constant dense<0.000000e+00> : vector<8x256xf32>
    %116 = tpu.matmul %115, %0, %cst_32 {dimension_numbers = #tpu.dot_dimension_numbers<[1], [0], [0], [1], [0, 0, 1, 1], [], []>} : vector<8x64xf32>, vector<64x256xf32>, vector<8x256xf32> -> vector<8x256xf32>
    %117 = arith.index_cast %c5_i32 : i32 to index
    %c0_33 = arith.constant 0 : index
    %c0_34 = arith.constant 0 : index
    %118 = vector.load %arg7[%117, %c0_33, %c0_34] : memref<8x8x256xf32, #tpu.memory_space<vmem>>, vector<1x8x256xf32>
    %119 = vector.shape_cast %118 : vector<1x8x256xf32> to vector<8x256xf32>
    %120 = arith.addf %119, %116 : vector<8x256xf32>
    %121 = vector.extract_strided_slice %120 {offsets = [0, 0], sizes = [8, 192], strides = [1, 1]} : vector<8x256xf32> to vector<8x192xf32>
    %122 = arith.negf %121 : vector<8x192xf32>
    %123 = math.exp %122 : vector<8x192xf32>
    %cst_35 = arith.constant 1.000000e+00 : f32
    %124 = vector.broadcast %cst_35 : f32 to vector<8x192xf32>
    %125 = arith.addf %124, %123 : vector<8x192xf32>
    %126 = arith.divf %124, %125 : vector<8x192xf32>
    %127 = vector.extract_strided_slice %120 {offsets = [0, 192], sizes = [8, 64], strides = [1, 1]} : vector<8x256xf32> to vector<8x64xf32>
    %128 = math.tanh %127 : vector<8x64xf32>
    %129 = vector.extract_strided_slice %126 {offsets = [0, 0], sizes = [8, 64], strides = [1, 1]} : vector<8x192xf32> to vector<8x64xf32>
    %130 = vector.extract_strided_slice %126 {offsets = [0, 64], sizes = [8, 64], strides = [1, 1]} : vector<8x192xf32> to vector<8x64xf32>
    %131 = vector.extract_strided_slice %126 {offsets = [0, 128], sizes = [8, 64], strides = [1, 1]} : vector<8x192xf32> to vector<8x64xf32>
    %132 = arith.mulf %130, %113 : vector<8x64xf32>
    %133 = arith.mulf %129, %128 : vector<8x64xf32>
    %134 = arith.addf %132, %133 : vector<8x64xf32>
    %135 = math.tanh %134 : vector<8x64xf32>
    %136 = arith.mulf %131, %135 : vector<8x64xf32>
    %c6_i32 = arith.constant 6 : i32
    %cst_36 = arith.constant dense<0.000000e+00> : vector<8x256xf32>
    %137 = tpu.matmul %136, %0, %cst_36 {dimension_numbers = #tpu.dot_dimension_numbers<[1], [0], [0], [1], [0, 0, 1, 1], [], []>} : vector<8x64xf32>, vector<64x256xf32>, vector<8x256xf32> -> vector<8x256xf32>
    %138 = arith.index_cast %c6_i32 : i32 to index
    %c0_37 = arith.constant 0 : index
    %c0_38 = arith.constant 0 : index
    %139 = vector.load %arg7[%138, %c0_37, %c0_38] : memref<8x8x256xf32, #tpu.memory_space<vmem>>, vector<1x8x256xf32>
    %140 = vector.shape_cast %139 : vector<1x8x256xf32> to vector<8x256xf32>
    %141 = arith.addf %140, %137 : vector<8x256xf32>
    %142 = vector.extract_strided_slice %141 {offsets = [0, 0], sizes = [8, 192], strides = [1, 1]} : vector<8x256xf32> to vector<8x192xf32>
    %143 = arith.negf %142 : vector<8x192xf32>
    %144 = math.exp %143 : vector<8x192xf32>
    %cst_39 = arith.constant 1.000000e+00 : f32
    %145 = vector.broadcast %cst_39 : f32 to vector<8x192xf32>
    %146 = arith.addf %145, %144 : vector<8x192xf32>
    %147 = arith.divf %145, %146 : vector<8x192xf32>
    %148 = vector.extract_strided_slice %141 {offsets = [0, 192], sizes = [8, 64], strides = [1, 1]} : vector<8x256xf32> to vector<8x64xf32>
    %149 = math.tanh %148 : vector<8x64xf32>
    %150 = vector.extract_strided_slice %147 {offsets = [0, 0], sizes = [8, 64], strides = [1, 1]} : vector<8x192xf32> to vector<8x64xf32>
    %151 = vector.extract_strided_slice %147 {offsets = [0, 64], sizes = [8, 64], strides = [1, 1]} : vector<8x192xf32> to vector<8x64xf32>
    %152 = vector.extract_strided_slice %147 {offsets = [0, 128], sizes = [8, 64], strides = [1, 1]} : vector<8x192xf32> to vector<8x64xf32>
    %153 = arith.mulf %151, %134 : vector<8x64xf32>
    %154 = arith.mulf %150, %149 : vector<8x64xf32>
    %155 = arith.addf %153, %154 : vector<8x64xf32>
    %156 = math.tanh %155 : vector<8x64xf32>
    %157 = arith.mulf %152, %156 : vector<8x64xf32>
    %c7_i32 = arith.constant 7 : i32
    %cst_40 = arith.constant dense<0.000000e+00> : vector<8x256xf32>
    %158 = tpu.matmul %157, %0, %cst_40 {dimension_numbers = #tpu.dot_dimension_numbers<[1], [0], [0], [1], [0, 0, 1, 1], [], []>} : vector<8x64xf32>, vector<64x256xf32>, vector<8x256xf32> -> vector<8x256xf32>
    %159 = arith.index_cast %c7_i32 : i32 to index
    %c0_41 = arith.constant 0 : index
    %c0_42 = arith.constant 0 : index
    %160 = vector.load %arg7[%159, %c0_41, %c0_42] : memref<8x8x256xf32, #tpu.memory_space<vmem>>, vector<1x8x256xf32>
    %161 = vector.shape_cast %160 : vector<1x8x256xf32> to vector<8x256xf32>
    %162 = arith.addf %161, %158 : vector<8x256xf32>
    %163 = vector.extract_strided_slice %162 {offsets = [0, 0], sizes = [8, 192], strides = [1, 1]} : vector<8x256xf32> to vector<8x192xf32>
    %164 = arith.negf %163 : vector<8x192xf32>
    %165 = math.exp %164 : vector<8x192xf32>
    %cst_43 = arith.constant 1.000000e+00 : f32
    %166 = vector.broadcast %cst_43 : f32 to vector<8x192xf32>
    %167 = arith.addf %166, %165 : vector<8x192xf32>
    %168 = arith.divf %166, %167 : vector<8x192xf32>
    %169 = vector.extract_strided_slice %162 {offsets = [0, 192], sizes = [8, 64], strides = [1, 1]} : vector<8x256xf32> to vector<8x64xf32>
    %170 = math.tanh %169 : vector<8x64xf32>
    %171 = vector.extract_strided_slice %168 {offsets = [0, 0], sizes = [8, 64], strides = [1, 1]} : vector<8x192xf32> to vector<8x64xf32>
    %172 = vector.extract_strided_slice %168 {offsets = [0, 64], sizes = [8, 64], strides = [1, 1]} : vector<8x192xf32> to vector<8x64xf32>
    %173 = vector.extract_strided_slice %168 {offsets = [0, 128], sizes = [8, 64], strides = [1, 1]} : vector<8x192xf32> to vector<8x64xf32>
    %174 = arith.mulf %172, %155 : vector<8x64xf32>
    %175 = arith.mulf %171, %170 : vector<8x64xf32>
    %176 = arith.addf %174, %175 : vector<8x64xf32>
    %177 = math.tanh %176 : vector<8x64xf32>
    %178 = arith.mulf %173, %177 : vector<8x64xf32>
    %c8_i32 = arith.constant 8 : i32
    %c0_44 = arith.constant 0 : index
    %c0_45 = arith.constant 0 : index
    %179 = vector.load %arg4[%c0_44, %c0_45] : memref<64x128xf32, #tpu.memory_space<vmem>>, vector<64x128xf32>
    %cst_46 = arith.constant dense<0.000000e+00> : vector<8x128xf32>
    %180 = tpu.matmul %178, %179, %cst_46 {dimension_numbers = #tpu.dot_dimension_numbers<[1], [0], [0], [1], [0, 0, 1, 1], [], []>} : vector<8x64xf32>, vector<64x128xf32>, vector<8x128xf32> -> vector<8x128xf32>
    %c0_47 = arith.constant 0 : index
    %c0_48 = arith.constant 0 : index
    %181 = vector.load %arg5[%c0_47, %c0_48] : memref<1x128xf32, #tpu.memory_space<vmem>>, vector<1x128xf32>
    %182 = vector.broadcast %181 : vector<1x128xf32> to vector<8x128xf32>
    %183 = arith.addf %180, %182 : vector<8x128xf32>
    %c0_49 = arith.constant 0 : index
    %c0_50 = arith.constant 0 : index
    %184 = vector.load %arg6[%c0_49, %c0_50] : memref<8x128xf32, #tpu.memory_space<vmem>>, vector<8x128xf32>
    tpu.vector_store %arg6[%c0_49, %c0_50], %183 {strides = array<i32>} : memref<8x128xf32, #tpu.memory_space<vmem>>, vector<8x128xf32>,
    return
  }
}

</mosaic_0001>

<bundles_post_ra>
// kernel: lstm_forward.1
= control target key start
LH: loop header
LB: loop body
LE: loop exit
PB: predicated region body
PF: predicated region fallthrough
CT: control target
= control target key end

     0   :  { %vm69_vm0 = vcmask 523264   ;;  %v1209_v28 = vmov 0.0   ;;  %s1210_s15 = smov 64   ;;  %s1672_s2 = inlined_call_operand.vmem [shape: f32[64,256], index: 2, kind: input, shape index: {}]   ;;  %s1673_s1 = inlined_call_operand.vmem [shape: f32[64,256], index: 1, kind: input, shape index: {}]   ;;  %s1674_s0 = inlined_call_operand.vmem [shape: f32[8,8,64], index: 0, kind: input, shape index: {}]   ;;  %s1675_s3 = inlined_call_operand.vmem [shape: f32[1,256], index: 3, kind: input, shape index: {}]   ;;  %s1676_s4 = inlined_call_operand.vmem [shape: f32[64,128], index: 4, kind: input, shape index: {}]   ;;  %s1677_s5 = inlined_call_operand.vmem [shape: f32[1,128], index: 5, kind: input, shape index: {}]   ;;  %s1678_s6 = inlined_call_operand.vmem [shape: f32[8,128], index: 6, kind: output, shape index: {}]  }
   0x1   :  { %v1249_v0 = vld [vmem:[%s1672_s2 + $0x78] sm:$0xff]  ;;  %v1254_v1 = vld [vmem:[%s1672_s2 + $0x68] sm:$0xff]  ;;  %v1289_v9 = vld [vmem:[%s1672_s2 + $0x70] sm:$0xff] }
   0x2   :  { %v62_v2 = vld [vmem:[%s1673_s1 + $0x78] sm:$0xff]  ;;  %223 = vmatpush.msra.mxu3 %v1249_v0  ;;  %v60_v3 = vld [vmem:[%s1673_s1 + $0x68] sm:$0xff]  ;;  %203 = vmatpush.msra.mxu2 %v1289_v9  ;;  %v1298_v11 = vld [vmem:[%s1672_s2 + $0x60] sm:$0xff] }
   0x3   :  { %143 = vmatpush.msra.mxu1 %v62_v2  ;;  %v1266_v4 = vld [vmem:[%s1672_s2 + $0x58] sm:$0xff]  ;;  %v1275_v6 = vld [vmem:[%s1672_s2 + $0x48] sm:$0xff]  ;;  %v61_v12 = vld [vmem:[%s1673_s1 + $0x70] sm:$0xff] }
   0x4   :  { %v58_v5 = vld [vmem:[%s1673_s1 + $0x58] sm:$0xff]  ;;  %224 = vmatpush.msra.mxu3 %v1254_v1  ;;  %v56_v7 = vld [vmem:[%s1673_s1 + $0x48] sm:$0xff]  ;;  %v1307_v13 = vld [vmem:[%s1672_s2 + $0x50] sm:$0xff]  ;;  %204 = vmatpush.msra.mxu2 %v1298_v11 }
   0x5   :  { %144 = vmatpush.msra.mxu1 %v60_v3  ;;  %v1284_v8 = vld [vmem:[%s1672_s2 + $0x38] sm:$0xff]  ;;  %v59_v14 = vld [vmem:[%s1673_s1 + $0x60] sm:$0xff]  ;;  %v1315_v15 = vld [vmem:[%s1672_s2 + $0x28] sm:$0xff]  ;;  %102 = vmatpush.msra.mxu0 %v61_v12 }
   0x6   :  { %225 = vmatpush.msra.mxu3 %v1266_v4  ;;  %v54_v10 = vld [vmem:[%s1673_s1 + $0x38] sm:$0xff]  ;;  %v52_v16 = vld [vmem:[%s1673_s1 + $0x28] sm:$0xff]  ;;  %v1325_v17 = vld [vmem:[%s1672_s2 + $0x40] sm:$0xff]  ;;  %205 = vmatpush.msra.mxu2 %v1307_v13 }
   0x7   :  { %145 = vmatpush.msra.mxu1 %v58_v5  ;;  %v57_v18 = vld [vmem:[%s1673_s1 + $0x50] sm:$0xff]  ;;  %v1333_v19 = vld [vmem:[%s1672_s2 + $0x18] sm:$0xff]  ;;  %103 = vmatpush.msra.mxu0 %v59_v14  ;;  %v55_v22 = vld [vmem:[%s1673_s1 + $0x40] sm:$0xff] }
   0x8   :  { %226 = vmatpush.msra.mxu3 %v1275_v6  ;;  %v50_v20 = vld [vmem:[%s1673_s1 + $0x18] sm:$0xff]  ;;  %v1343_v21 = vld [vmem:[%s1672_s2 + $0x30] sm:$0xff]  ;;  %v1351_v23 = vld [vmem:[%s1672_s2 + $0x8] sm:$0xff]  ;;  %206 = vmatpush.msra.mxu2 %v1325_v17 }
   0x9   :  { %146 = vmatpush.msra.mxu1 %v56_v7  ;;  %v48_v24 = vld [vmem:[%s1673_s1 + $0x8] sm:$0xff]  ;;  %104 = vmatpush.msra.mxu0 %v57_v18  ;;  %v39_v25 = vld [vmem:[%s1674_s0] sm:$0xff]  ;;  %v53_v27 = vld [vmem:[%s1673_s1 + $0x30] sm:$0xff] }
   0xa   :  { %227 = vmatpush.msra.mxu3 %v1284_v8  ;;  %207 = vmatpush.msra.mxu2 %v1343_v21  ;;  %v1365_v26 = vld [vmem:[%s1672_s2 + $0x20] sm:$0xff]  ;;  %v1375_v29 = vld [vmem:[%s1672_s2 + $0x10] sm:$0xff] }
   0xb   :  { %147 = vmatpush.msra.mxu1 %v54_v10  ;;  %105 = vmatpush.msra.mxu0 %v55_v22  ;;  %v51_v30 = vld [vmem:[%s1673_s1 + $0x20] sm:$0xff]  ;;  %v49_v32 = vld [vmem:[%s1673_s1 + $0x10] sm:$0xff]  ;;  %v40_v10 = vld [vmem:[%s1674_s0 + $0x8] sm:$0xff] }
   0xc   :  { %228 = vmatpush.msra.mxu3 %v1315_v15  ;;  %208 = vmatpush.msra.mxu2 %v1365_v26  ;;  %v1384_v31 = vld [vmem:[%s1672_s2] sm:$0xff] }
   0xd   :  { %148 = vmatpush.msra.mxu1 %v52_v16  ;;  %106 = vmatpush.msra.mxu0 %v53_v27  ;;  %v47_v33 = vld [vmem:[%s1673_s1] sm:$0xff] }
   0xe   :  { %229 = vmatpush.msra.mxu3 %v1333_v19  ;;  %209 = vmatpush.msra.mxu2 %v1375_v29  ;;  %v63_v34 = vld [vmem:[%s1675_s3] sm:$0x3] }
   0xf   :  { %149 = vmatpush.msra.mxu1 %v50_v20  ;;  %107 = vmatpush.msra.mxu0 %v51_v30  ;;  %v1462_v35 = vperm.slane %v63_v34, 1  ;;  %v1466_v41 = vperm.slane %v63_v34, 0 }
  0x10   :  { %230 = vmatpush.msra.mxu3 %v1351_v23  ;;  %210 = vmatpush.msra.mxu2 %v1384_v31 }
  0x11   :  { %150 = vmatpush.msra.mxu1 %v48_v24  ;;  %231 = vmatmul.f32.vlgmr.msra.gmra.mxu3 %v1209_v28 }
  0x12   :  { %1071 = vmatmul.msk.f32.vlgmr.msra.gmra.mxu1 %vm69_vm0, %v39_v25  ;;  %326 = vmatpush.msrb.mxu3 %v1249_v0 }
  0x13   :  { %638 = vmatpush.msrb.mxu1 %v1249_v0  ;;  %108 = vmatpush.msra.mxu0 %v49_v32 }
  0x14   :  { %327 = vmatpush.msrb.mxu3 %v1254_v1  ;;  %211 = vmatmul.f32.vlgmr.msra.gmra.mxu2 %v1209_v28 }
  0x15   :  { %639 = vmatpush.msrb.mxu1 %v1254_v1  ;;  %109 = vmatpush.msra.mxu0 %v47_v33 }
  0x16   :  { %328 = vmatpush.msrb.mxu3 %v1266_v4  ;;  %306 = vmatpush.msrb.mxu2 %v1289_v9 }
  0x17   :  { %1063 = vmatmul.msk.f32.vlgmr.msra.gmra.mxu0 %vm69_vm0, %v39_v25  ;;  %640 = vmatpush.msrb.mxu1 %v1266_v4 }
  0x18   :  { %329 = vmatpush.msrb.mxu3 %v1275_v6  ;;  %307 = vmatpush.msrb.mxu2 %v1298_v11 }
  0x19   :  { %618 = vmatpush.msrb.mxu0 %v1289_v9  ;;  %641 = vmatpush.msrb.mxu1 %v1275_v6 }
  0x1a   :  { %330 = vmatpush.msrb.mxu3 %v1284_v8  ;;  %308 = vmatpush.msrb.mxu2 %v1307_v13 }
  0x1b   :  { %619 = vmatpush.msrb.mxu0 %v1298_v11  ;;  %642 = vmatpush.msrb.mxu1 %v1284_v8 }
  0x1c   :  { %331 = vmatpush.msrb.mxu3 %v1315_v15  ;;  %309 = vmatpush.msrb.mxu2 %v1325_v17 }
  0x1d   :  { %620 = vmatpush.msrb.mxu0 %v1307_v13  ;;  %643 = vmatpush.msrb.mxu1 %v1315_v15 }
  0x1e   :  { %332 = vmatpush.msrb.mxu3 %v1333_v19  ;;  %310 = vmatpush.msrb.mxu2 %v1343_v21 }
  0x1f   :  { %621 = vmatpush.msrb.mxu0 %v1325_v17  ;;  %644 = vmatpush.msrb.mxu1 %v1333_v19 }
  0x20   :  { %333 = vmatpush.msrb.mxu3 %v1351_v23  ;;  %311 = vmatpush.msrb.mxu2 %v1365_v26 }
  0x21   :  { %622 = vmatpush.msrb.mxu0 %v1343_v21  ;;  %645 = vmatpush.msrb.mxu1 %v1351_v23 }
  0x22   :  { %430 = vmatpush.msra.mxu3 %v1249_v0  ;;  %312 = vmatpush.msrb.mxu2 %v1375_v29 }
  0x23   :  { %623 = vmatpush.msrb.mxu0 %v1365_v26  ;;  %846 = vmatpush.msra.mxu1 %v1249_v0 }
  0x24   :  { %431 = vmatpush.msra.mxu3 %v1254_v1  ;;  %313 = vmatpush.msrb.mxu2 %v1384_v31 }
  0x25   :  { %624 = vmatpush.msrb.mxu0 %v1375_v29  ;;  %847 = vmatpush.msra.mxu1 %v1254_v1 }
  0x26   :  { %432 = vmatpush.msra.mxu3 %v1266_v4  ;;  %410 = vmatpush.msra.mxu2 %v1289_v9 }
  0x27   :  { %625 = vmatpush.msrb.mxu0 %v1384_v31  ;;  %848 = vmatpush.msra.mxu1 %v1266_v4 }
  0x28   :  { %433 = vmatpush.msra.mxu3 %v1275_v6  ;;  %411 = vmatpush.msra.mxu2 %v1298_v11 }
  0x29   :  { %826 = vmatpush.msra.mxu0 %v1289_v9  ;;  %849 = vmatpush.msra.mxu1 %v1275_v6 }
  0x2a   :  { %434 = vmatpush.msra.mxu3 %v1284_v8  ;;  %412 = vmatpush.msra.mxu2 %v1307_v13 }
  0x2b   :  { %827 = vmatpush.msra.mxu0 %v1298_v11  ;;  %850 = vmatpush.msra.mxu1 %v1284_v8 }
  0x2c   :  { %435 = vmatpush.msra.mxu3 %v1315_v15  ;;  %413 = vmatpush.msra.mxu2 %v1325_v17 }
  0x2d   :  { %828 = vmatpush.msra.mxu0 %v1307_v13  ;;  %851 = vmatpush.msra.mxu1 %v1315_v15 }
  0x2e   :  { %436 = vmatpush.msra.mxu3 %v1333_v19  ;;  %414 = vmatpush.msra.mxu2 %v1343_v21 }
  0x2f   :  { %829 = vmatpush.msra.mxu0 %v1325_v17  ;;  %852 = vmatpush.msra.mxu1 %v1333_v19 }
  0x30   :  { %437 = vmatpush.msra.mxu3 %v1351_v23  ;;  %415 = vmatpush.msra.mxu2 %v1365_v26 }
  0x31   :  { %830 = vmatpush.msra.mxu0 %v1343_v21  ;;  %853 = vmatpush.msra.mxu1 %v1351_v23 }
  0x32   :  { %416 = vmatpush.msra.mxu2 %v1375_v29  ;;  %1064 = vmatmul.msk.f32.gmra.mxu0 %vm69_vm0, %v40_v10 }
  0x33   :  { %831 = vmatpush.msra.mxu0 %v1365_v26  ;;  %1072 = vmatmul.msk.f32.gmra.mxu1 %vm69_vm0, %v40_v10 }
  0x34   :  { %417 = vmatpush.msra.mxu2 %v1384_v31 }
  0x35   :  { %832 = vmatpush.msra.mxu0 %v1375_v29 }
  0x37   :  { %833 = vmatpush.msra.mxu0 %v1384_v31 }
  0x8f   :  { %v152_v36 = vpop.f32.mrf.mxu1 }
  0x90   :  { %v153_v37 = vadd.f32 %v152_v36, %v1462_v35 }
  0x94   :  { %v232_v38 = vpop.f32.mrf.mxu3  ;;  %v111_v42 = vpop.f32.mrf.mxu0 }
  0x95   :  { %v238_v39 = vadd.f32 %v232_v38, %v153_v37  ;;  %v112_v43 = vadd.f32 %v111_v42, %v1466_v41 }
  0x97   :  { %1113 = vtanh.f32 %v238_v39  ;;  %v212_v44 = vpop.f32.mrf.mxu2  ;;  %v1080_v3 = vmul.f32 -1.442695, %v238_v39 }
  0x98   :  { %v237_v45 = vadd.f32 %v212_v44, %v112_v43 }
  0x9a   :  { %v1079_v46 = vmul.f32 -1.442695, %v237_v45 }
  0x9c   :  { %1115 = vpow2.f32 %v1079_v46 }
  0x9d   :  { %v1114_v40 = vpop.eup %1113 }
  0x9e   :  { %280 = vrot.lane.b32.xlu0 %v1114_v40, %s1210_s15 }
  0xa2   :  { %v1116_v47 = vpop.eup %1115 }
  0xa3   :  { %v245_v48 = vadd.f32 1.0, %v1116_v47 }
  0xa5   :  { %1117 = vrcp.f32 %v245_v48  ;;  %vm252_vm1 = vweird.f32 %v245_v48  ;;  %v258_v53 = vand.u32 2147483648, %v245_v48  ;;  %v256_v55 = vand.u32 2147483647, %v245_v48 }
  0xa7   :  { %v259_v56 = vor.u32 1.1754944e-38, %v258_v53  ;;  %vm257_vm4 = vcmp.eq.f32.partialorder %v256_v55, 8.507059e+37 }
  0xab   :  { %v1118_v49 = vpop.eup %1117 }
  0xac   :  { %v248_v50 = vmul.f32 %v1118_v49, %v245_v48  ;;  %vm253_vm2 = vweird.f32 %v1118_v49 }
  0xad   :  { %vm254_vm3 = vmor %vm252_vm1, %vm253_vm2 }
  0xae   :  { %v249_v51 = vsub.f32 1.0, %v248_v50 }
  0xaf   :  { %v114_v39 = vpop.f32.mrf.mxu0 }
  0xb0   :  { %v250_v52 = vmul.f32 %v1118_v49, %v249_v51  ;;  %v155_v33 = vpop.f32.mrf.mxu1  ;;  %v115_v40 = vadd.f32 %v114_v39, %v1466_v41 }
  0xb1   :  { %v156_v34 = vadd.f32 %v155_v33, %v1462_v35 }
  0xb2   :  { %v251_v54 = vadd.f32 %v1118_v49, %v250_v52 }
  0xb4   :  { %v255_v57 = vsel %vm254_vm3, %v1118_v49, %v251_v54 }
  0xb5   :  { %v260_v59 = vsel %vm257_vm4, %v259_v56, %v255_v57 }
  0xb6   :  { %v278_v61 = vmul.f32 0.0, %v260_v59 }
 0x110   :  { %v281_v58 = vpop.permute.xlu0 %280 }
 0x111   :  { %v283_v60 = vmul.f32 %v281_v58, %v260_v59 }
 0x113   :  { %285 = vrot.lane.b32.xlu0 %v283_v60, %s1210_s15 }
 0x185   :  { %v286_v62 = vpop.permute.xlu0 %285 }
 0x186   :  { %v1470_v63 = vadd.f32 %v286_v62, %v278_v61 }
 0x188   :  { %1119 = vtanh.f32 %v1470_v63 }
 0x189   :  { %1121 = vpow2.f32 %v1080_v3 }
 0x18e   :  { %v1120_v2 = vpop.eup %1119 }
 0x18f   :  { %291 = vrot.lane.b32.xlu1 %v1120_v2, %s1210_s15  ;;  %v1122_v5 = vpop.eup %1121 }
 0x190   :  { %v246_v7 = vadd.f32 1.0, %v1122_v5 }
 0x192   :  { %1123 = vrcp.f32 %v246_v7  ;;  %v273_v22 = vand.u32 2147483648, %v246_v7  ;;  %vm267_vm6 = vweird.f32 %v246_v7  ;;  %v271_v24 = vand.u32 2147483647, %v246_v7 }
 0x194   :  { %v274_v27 = vor.u32 1.1754944e-38, %v273_v22  ;;  %vm272_vm8 = vcmp.eq.f32.partialorder %v271_v24, 8.507059e+37 }
 0x198   :  { %v1124_v12 = vpop.eup %1123 }
 0x199   :  { %v263_v14 = vmul.f32 %v1124_v12, %v246_v7  ;;  %vm268_vm5 = vweird.f32 %v1124_v12  ;;  %v41_v7 = vld [vmem:[%s1674_s0 + $0x10] sm:$0xff] }
 0x19a   :  { %vm269_vm7 = vmor %vm267_vm6, %vm268_vm5  ;;  %1065 = vmatmul.msk.f32.gmra.mxu0 %vm69_vm0, %v41_v7  ;;  %1073 = vmatmul.msk.f32.gmra.mxu1 %vm69_vm0, %v41_v7 }
 0x19b   :  { %v264_v16 = vsub.f32 1.0, %v263_v14 }
 0x19d   :  { %v265_v18 = vmul.f32 %v1124_v12, %v264_v16 }
 0x19f   :  { %v266_v20 = vadd.f32 %v1124_v12, %v265_v18 }
 0x1a1   :  { %v270_v25 = vsel %vm269_vm7, %v1124_v12, %v266_v20 }
 0x1a2   :  { %v275_v28 = vsel %vm272_vm8, %v274_v27, %v270_v25 }
 0x201   :  { %v292_v30 = vpop.permute.xlu1 %291 }
 0x202   :  { %v294_v32 = vmul.f32 %v292_v30, %v275_v28 }
 0x204   :  { %1081 = vmatmul.msk.f32.vlgmr.msrb.gmra.mxu2 %vm69_vm0, %v294_v32  ;;  %1082 = vmatmul.msk.f32.vlgmr.msrb.gmra.mxu3 %vm69_vm0, %v294_v32 }
 0x205   :  { %514 = vmatpush.msrb.mxu2 %v1289_v9  ;;  %534 = vmatpush.msrb.mxu3 %v1249_v0 }
 0x207   :  { %515 = vmatpush.msrb.mxu2 %v1298_v11  ;;  %535 = vmatpush.msrb.mxu3 %v1254_v1 }
 0x209   :  { %516 = vmatpush.msrb.mxu2 %v1307_v13  ;;  %536 = vmatpush.msrb.mxu3 %v1266_v4 }
 0x20b   :  { %517 = vmatpush.msrb.mxu2 %v1325_v17  ;;  %537 = vmatpush.msrb.mxu3 %v1275_v6 }
 0x20d   :  { %518 = vmatpush.msrb.mxu2 %v1343_v21  ;;  %538 = vmatpush.msrb.mxu3 %v1284_v8 }
 0x20f   :  { %519 = vmatpush.msrb.mxu2 %v1365_v26  ;;  %539 = vmatpush.msrb.mxu3 %v1315_v15 }
 0x211   :  { %520 = vmatpush.msrb.mxu2 %v1375_v29  ;;  %540 = vmatpush.msrb.mxu3 %v1333_v19 }
 0x213   :  { %521 = vmatpush.msrb.mxu2 %v1384_v31  ;;  %541 = vmatpush.msrb.mxu3 %v1351_v23 }
 0x217   :  { %v158_v30 = vpop.f32.mrf.mxu1 }
 0x218   :  { %v159_v32 = vadd.f32 %v158_v30, %v1462_v35 }
 0x287   :  { %v335_v36 = vpop.f32.mrf.mxu3  ;;  %v315_v42 = vpop.f32.mrf.mxu2 }
 0x288   :  { %v342_v37 = vadd.f32 %v335_v36, %v156_v34  ;;  %v341_v43 = vadd.f32 %v315_v42, %v115_v40 }
 0x28a   :  { %1125 = vtanh.f32 %v342_v37  ;;  %v1083_v44 = vmul.f32 -1.442695, %v341_v43  ;;  %v1084_v2 = vmul.f32 -1.442695, %v342_v37  ;;  %v117_v37 = vpop.f32.mrf.mxu0 }
 0x28c   :  { %1127 = vpow2.f32 %v1083_v44 }
 0x290   :  { %v1126_v38 = vpop.eup %1125 }
 0x291   :  { %384 = vrot.lane.b32.xlu1 %v1126_v38, %s1210_s15  ;;  %v118_v38 = vadd.f32 %v117_v37, %v1466_v41 }
 0x292   :  { %v1128_v45 = vpop.eup %1127 }
 0x293   :  { %v349_v46 = vadd.f32 1.0, %v1128_v45 }
 0x295   :  { %1129 = vrcp.f32 %v349_v46  ;;  %v362_v52 = vand.u32 2147483648, %v349_v46  ;;  %vm356_vm10 = vweird.f32 %v349_v46  ;;  %v360_v53 = vand.u32 2147483647, %v349_v46 }
 0x297   :  { %v363_v55 = vor.u32 1.1754944e-38, %v362_v52  ;;  %vm361_vm12 = vcmp.eq.f32.partialorder %v360_v53, 8.507059e+37 }
 0x29b   :  { %v1130_v47 = vpop.eup %1129 }
 0x29c   :  { %v352_v48 = vmul.f32 %v1130_v47, %v349_v46  ;;  %vm357_vm9 = vweird.f32 %v1130_v47 }
 0x29d   :  { %vm358_vm11 = vmor %vm356_vm10, %vm357_vm9 }
 0x29e   :  { %v353_v49 = vsub.f32 1.0, %v352_v48 }
 0x2a0   :  { %v354_v50 = vmul.f32 %v1130_v47, %v353_v49 }
 0x2a2   :  { %v355_v51 = vadd.f32 %v1130_v47, %v354_v50 }
 0x2a4   :  { %v359_v54 = vsel %vm358_vm11, %v1130_v47, %v355_v51 }
 0x2a5   :  { %v364_v57 = vsel %vm361_vm12, %v363_v55, %v359_v54 }
 0x2a6   :  { %v382_v59 = vmul.f32 %v364_v57, %v1470_v63 }
 0x303   :  { %v385_v56 = vpop.permute.xlu1 %384 }
 0x304   :  { %v387_v58 = vmul.f32 %v385_v56, %v364_v57 }
 0x306   :  { %389 = vrot.lane.b32.xlu2 %v387_v58, %s1210_s15 }
 0x360   :  { %v390_v60 = vpop.permute.xlu2 %389 }
 0x361   :  { %v1502_v61 = vadd.f32 %v390_v60, %v382_v59 }
 0x363   :  { %1131 = vtanh.f32 %v1502_v61 }
 0x364   :  { %1133 = vpow2.f32 %v1084_v2 }
 0x369   :  { %v1132_v62 = vpop.eup %1131 }
 0x36a   :  { %395 = vrot.lane.b32.xlu2 %v1132_v62, %s1210_s15  ;;  %v1134_v3 = vpop.eup %1133 }
 0x36b   :  { %v350_v5 = vadd.f32 1.0, %v1134_v3 }
 0x36d   :  { %1135 = vrcp.f32 %v350_v5  ;;  %v377_v18 = vand.u32 2147483648, %v350_v5  ;;  %vm371_vm14 = vweird.f32 %v350_v5  ;;  %v375_v20 = vand.u32 2147483647, %v350_v5 }
 0x36f   :  { %v378_v24 = vor.u32 1.1754944e-38, %v377_v18  ;;  %vm376_vm1 = vcmp.eq.f32.partialorder %v375_v20, 8.507059e+37 }
 0x373   :  { %v1136_v63 = vpop.eup %1135 }
 0x374   :  { %v367_v10 = vmul.f32 %v1136_v63, %v350_v5  ;;  %vm372_vm13 = vweird.f32 %v1136_v63  ;;  %v42_v5 = vld [vmem:[%s1674_s0 + $0x18] sm:$0xff] }
 0x375   :  { %vm373_vm15 = vmor %vm371_vm14, %vm372_vm13  ;;  %1066 = vmatmul.msk.f32.gmra.mxu0 %vm69_vm0, %v42_v5  ;;  %1074 = vmatmul.msk.f32.gmra.mxu1 %vm69_vm0, %v42_v5 }
 0x376   :  { %v368_v12 = vsub.f32 1.0, %v367_v10 }
 0x378   :  { %v369_v14 = vmul.f32 %v1136_v63, %v368_v12 }
 0x37a   :  { %v370_v16 = vadd.f32 %v1136_v63, %v369_v14 }
 0x37c   :  { %v374_v22 = vsel %vm373_vm15, %v1136_v63, %v370_v16 }
 0x37d   :  { %v379_v25 = vsel %vm376_vm1, %v378_v24, %v374_v22 }
 0x3c4   :  { %v396_v27 = vpop.permute.xlu2 %395 }
 0x3c5   :  { %v398_v28 = vmul.f32 %v396_v27, %v379_v25 }
 0x3c7   :  { %1085 = vmatmul.msk.f32.vlgmr.msra.gmra.mxu2 %vm69_vm0, %v398_v28  ;;  %1086 = vmatmul.msk.f32.vlgmr.msra.gmra.mxu3 %vm69_vm0, %v398_v28 }
 0x3c8   :  { %722 = vmatpush.msra.mxu2 %v1289_v9  ;;  %742 = vmatpush.msra.mxu3 %v1249_v0 }
 0x3ca   :  { %723 = vmatpush.msra.mxu2 %v1298_v11  ;;  %743 = vmatpush.msra.mxu3 %v1254_v1 }
 0x3cc   :  { %724 = vmatpush.msra.mxu2 %v1307_v13  ;;  %744 = vmatpush.msra.mxu3 %v1266_v4 }
 0x3ce   :  { %725 = vmatpush.msra.mxu2 %v1325_v17  ;;  %745 = vmatpush.msra.mxu3 %v1275_v6 }
 0x3d0   :  { %726 = vmatpush.msra.mxu2 %v1343_v21  ;;  %746 = vmatpush.msra.mxu3 %v1284_v8 }
 0x3d2   :  { %727 = vmatpush.msra.mxu2 %v1365_v26  ;;  %747 = vmatpush.msra.mxu3 %v1315_v15 }
 0x3d4   :  { %728 = vmatpush.msra.mxu2 %v1375_v29  ;;  %748 = vmatpush.msra.mxu3 %v1333_v19 }
 0x3d6   :  { %729 = vmatpush.msra.mxu2 %v1384_v31  ;;  %749 = vmatpush.msra.mxu3 %v1351_v23 }
 0x44a   :  { %v439_v33 = vpop.f32.mrf.mxu3  ;;  %v419_v39 = vpop.f32.mrf.mxu2 }
 0x44b   :  { %v446_v34 = vadd.f32 %v439_v33, %v159_v32  ;;  %v445_v40 = vadd.f32 %v419_v39, %v118_v38  ;;  %v43_v38 = vld [vmem:[%s1674_s0 + $0x20] sm:$0xff]  ;;  %v44_v39 = vld [vmem:[%s1674_s0 + $0x28] sm:$0xff] }
 0x44c   :  { %1067 = vmatmul.msk.f32.gmra.mxu0 %vm69_vm0, %v43_v38  ;;  %1075 = vmatmul.msk.f32.gmra.mxu1 %vm69_vm0, %v43_v38 }
 0x44d   :  { %1137 = vtanh.f32 %v446_v34  ;;  %v1087_v42 = vmul.f32 -1.442695, %v445_v40  ;;  %v1088_v62 = vmul.f32 -1.442695, %v446_v34  ;;  %v45_v40 = vld [vmem:[%s1674_s0 + $0x30] sm:$0xff] }
 0x44f   :  { %1139 = vpow2.f32 %v1087_v42 }
 0x453   :  { %v1138_v36 = vpop.eup %1137 }
 0x454   :  { %488 = vrot.lane.b32.xlu0 %v1138_v36, %s1210_s15  ;;  %1068 = vmatmul.msk.f32.gmra.mxu0 %vm69_vm0, %v44_v39 }
 0x455   :  { %v1140_v43 = vpop.eup %1139  ;;  %1076 = vmatmul.msk.f32.gmra.mxu1 %vm69_vm0, %v44_v39 }
 0x456   :  { %v453_v44 = vadd.f32 1.0, %v1140_v43 }
 0x458   :  { %1141 = vrcp.f32 %v453_v44  ;;  %v466_v50 = vand.u32 2147483648, %v453_v44  ;;  %vm460_vm3 = vweird.f32 %v453_v44  ;;  %v464_v51 = vand.u32 2147483647, %v453_v44 }
 0x45a   :  { %v467_v53 = vor.u32 1.1754944e-38, %v466_v50  ;;  %vm465_vm5 = vcmp.eq.f32.partialorder %v464_v51, 8.507059e+37 }
 0x45c   :  { %1069 = vmatmul.msk.f32.gmra.mxu0 %vm69_vm0, %v45_v40 }
 0x45d   :  { %1077 = vmatmul.msk.f32.gmra.mxu1 %vm69_vm0, %v45_v40 }
 0x45e   :  { %v1142_v45 = vpop.eup %1141 }
 0x45f   :  { %v456_v46 = vmul.f32 %v1142_v45, %v453_v44  ;;  %vm461_vm2 = vweird.f32 %v1142_v45  ;;  %v46_v44 = vld [vmem:[%s1674_s0 + $0x38] sm:$0xff] }
 0x460   :  { %vm462_vm4 = vmor %vm460_vm3, %vm461_vm2 }
 0x461   :  { %v457_v47 = vsub.f32 1.0, %v456_v46 }
 0x463   :  { %v458_v48 = vmul.f32 %v1142_v45, %v457_v47 }
 0x464   :  { %1070 = vmatmul.msk.f32.gmra.mxu0 %vm69_vm0, %v46_v44 }
 0x465   :  { %v459_v49 = vadd.f32 %v1142_v45, %v458_v48  ;;  %1078 = vmatmul.msk.f32.gmra.mxu1 %vm69_vm0, %v46_v44 }
 0x467   :  { %v463_v52 = vsel %vm462_vm4, %v1142_v45, %v459_v49 }
 0x468   :  { %v468_v55 = vsel %vm465_vm5, %v467_v53, %v463_v52 }
 0x469   :  { %v486_v57 = vmul.f32 %v468_v55, %v1502_v61 }
 0x4c6   :  { %v489_v54 = vpop.permute.xlu0 %488 }
 0x4c7   :  { %v491_v56 = vmul.f32 %v489_v54, %v468_v55 }
 0x4c9   :  { %493 = vrot.lane.b32.xlu1 %v491_v56, %s1210_s15 }
 0x53b   :  { %v494_v58 = vpop.permute.xlu1 %493 }
 0x53c   :  { %v1534_v59 = vadd.f32 %v494_v58, %v486_v57 }
 0x53e   :  { %1143 = vtanh.f32 %v1534_v59 }
 0x53f   :  { %1145 = vpow2.f32 %v1088_v62 }
 0x544   :  { %v1144_v60 = vpop.eup %1143 }
 0x545   :  { %499 = vrot.lane.b32.xlu2 %v1144_v60, %s1210_s15  ;;  %v1146_v2 = vpop.eup %1145 }
 0x546   :  { %v454_v3 = vadd.f32 1.0, %v1146_v2 }
 0x548   :  { %1147 = vrcp.f32 %v454_v3  ;;  %v481_v14 = vand.u32 2147483648, %v454_v3  ;;  %vm475_vm7 = vweird.f32 %v454_v3  ;;  %v479_v16 = vand.u32 2147483647, %v454_v3 }
 0x54a   :  { %v482_v20 = vor.u32 1.1754944e-38, %v481_v14  ;;  %vm480_vm9 = vcmp.eq.f32.partialorder %v479_v16, 8.507059e+37 }
 0x54e   :  { %v1148_v61 = vpop.eup %1147 }
 0x54f   :  { %v471_v7 = vmul.f32 %v1148_v61, %v454_v3  ;;  %vm476_vm6 = vweird.f32 %v1148_v61 }
 0x550   :  { %vm477_vm8 = vmor %vm475_vm7, %vm476_vm6 }
 0x551   :  { %v472_v63 = vsub.f32 1.0, %v471_v7 }
 0x553   :  { %v473_v10 = vmul.f32 %v1148_v61, %v472_v63 }
 0x555   :  { %v474_v12 = vadd.f32 %v1148_v61, %v473_v10 }
 0x557   :  { %v478_v18 = vsel %vm477_vm8, %v1148_v61, %v474_v12 }
 0x558   :  { %v483_v22 = vsel %vm480_vm9, %v482_v20, %v478_v18 }
 0x59f   :  { %v500_v24 = vpop.permute.xlu2 %499 }
 0x5a0   :  { %v502_v25 = vmul.f32 %v500_v24, %v483_v22 }
 0x5a2   :  { %1089 = vmatmul.msk.f32.vlgmr.msrb.gmra.mxu2 %vm69_vm0, %v502_v25  ;;  %1090 = vmatmul.msk.f32.vlgmr.msrb.gmra.mxu3 %vm69_vm0, %v502_v25 }
 0x5a3   :  { %930 = vmatpush.msrb.mxu2 %v1289_v9  ;;  %950 = vmatpush.msrb.mxu3 %v1249_v0  ;;  %v161_v0 = vpop.f32.mrf.mxu1 }
 0x5a5   :  { %931 = vmatpush.msrb.mxu2 %v1298_v11  ;;  %951 = vmatpush.msrb.mxu3 %v1254_v1  ;;  %v162_v1 = vadd.f32 %v161_v0, %v1462_v35 }
 0x5a7   :  { %932 = vmatpush.msrb.mxu2 %v1307_v13  ;;  %952 = vmatpush.msrb.mxu3 %v1266_v4 }
 0x5a9   :  { %933 = vmatpush.msrb.mxu2 %v1325_v17  ;;  %953 = vmatpush.msrb.mxu3 %v1275_v6 }
 0x5ab   :  { %934 = vmatpush.msrb.mxu2 %v1343_v21  ;;  %954 = vmatpush.msrb.mxu3 %v1284_v8  ;;  %v120_v8 = vpop.f32.mrf.mxu0  ;;  %v164_v2 = vpop.f32.mrf.mxu1 }
 0x5ac   :  { %v121_v11 = vadd.f32 %v120_v8, %v1466_v41  ;;  %v165_v7 = vadd.f32 %v164_v2, %v1462_v35 }
 0x5ad   :  { %935 = vmatpush.msrb.mxu2 %v1365_v26  ;;  %955 = vmatpush.msrb.mxu3 %v1315_v15 }
 0x5af   :  { %936 = vmatpush.msrb.mxu2 %v1375_v29  ;;  %956 = vmatpush.msrb.mxu3 %v1333_v19 }
 0x5b1   :  { %937 = vmatpush.msrb.mxu2 %v1384_v31  ;;  %957 = vmatpush.msrb.mxu3 %v1351_v23 }
 0x5b3   :  { %v1592_v3 = vpop.f32.mrf.mxu1  ;;  %v123_v14 = vpop.f32.mrf.mxu0 }
 0x5b4   :  { %v124_v22 = vadd.f32 %v123_v14, %v1466_v41 }
 0x5bb   :  { %v1594_v5 = vpop.f32.mrf.mxu1  ;;  %v1600_v16 = vpop.f32.mrf.mxu0 }
 0x5c3   :  { %v1596_v61 = vpop.f32.mrf.mxu1  ;;  %v1602_v18 = vpop.f32.mrf.mxu0 }
 0x5cb   :  { %v1604_v20 = vpop.f32.mrf.mxu0 }
 0x625   :  { %v543_v4 = vpop.f32.mrf.mxu3  ;;  %v523_v13 = vpop.f32.mrf.mxu2 }
 0x626   :  { %v550_v6 = vadd.f32 %v543_v4, %v162_v1  ;;  %v549_v15 = vadd.f32 %v523_v13, %v121_v11 }
 0x628   :  { %1149 = vtanh.f32 %v550_v6  ;;  %v1091_v17 = vmul.f32 -1.442695, %v549_v15  ;;  %v1092_v47 = vmul.f32 -1.442695, %v550_v6 }
 0x62a   :  { %1151 = vpow2.f32 %v1091_v17 }
 0x62e   :  { %v1150_v9 = vpop.eup %1149 }
 0x62f   :  { %592 = vrot.lane.b32.xlu0 %v1150_v9, %s1210_s15 }
 0x630   :  { %v1152_v19 = vpop.eup %1151 }
 0x631   :  { %v557_v21 = vadd.f32 1.0, %v1152_v19 }
 0x633   :  { %1153 = vrcp.f32 %v557_v21  ;;  %v570_v28 = vand.u32 2147483648, %v557_v21  ;;  %vm564_vm11 = vweird.f32 %v557_v21  ;;  %v568_v30 = vand.u32 2147483647, %v557_v21 }
 0x635   :  { %v571_v33 = vor.u32 1.1754944e-38, %v570_v28  ;;  %vm569_vm13 = vcmp.eq.f32.partialorder %v568_v30, 8.507059e+37 }
 0x639   :  { %v1154_v23 = vpop.eup %1153 }
 0x63a   :  { %v560_v26 = vmul.f32 %v1154_v23, %v557_v21  ;;  %vm565_vm10 = vweird.f32 %v1154_v23 }
 0x63b   :  { %vm566_vm12 = vmor %vm564_vm11, %vm565_vm10 }
 0x63c   :  { %v561_v29 = vsub.f32 1.0, %v560_v26 }
 0x63e   :  { %v562_v31 = vmul.f32 %v1154_v23, %v561_v29 }
 0x640   :  { %v563_v27 = vadd.f32 %v1154_v23, %v562_v31 }
 0x642   :  { %v567_v32 = vsel %vm566_vm12, %v1154_v23, %v563_v27 }
 0x643   :  { %v572_v36 = vsel %vm569_vm13, %v571_v33, %v567_v32 }
 0x644   :  { %v590_v42 = vmul.f32 %v572_v36, %v1534_v59 }
 0x6a1   :  { %v593_v34 = vpop.permute.xlu0 %592 }
 0x6a2   :  { %v595_v37 = vmul.f32 %v593_v34, %v572_v36 }
 0x6a4   :  { %597 = vrot.lane.b32.xlu1 %v595_v37, %s1210_s15 }
 0x716   :  { %v598_v43 = vpop.permute.xlu1 %597 }
 0x717   :  { %v1584_v45 = vadd.f32 %v598_v43, %v590_v42 }
 0x719   :  { %1155 = vtanh.f32 %v1584_v45 }
 0x71a   :  { %1157 = vpow2.f32 %v1092_v47 }
 0x71f   :  { %v1156_v46 = vpop.eup %1155 }
 0x720   :  { %603 = vrot.lane.b32.xlu2 %v1156_v46, %s1210_s15  ;;  %v1158_v48 = vpop.eup %1157 }
 0x721   :  { %v558_v49 = vadd.f32 1.0, %v1158_v48 }
 0x723   :  { %1159 = vrcp.f32 %v558_v49  ;;  %v585_v55 = vand.u32 2147483648, %v558_v49  ;;  %vm579_vm15 = vweird.f32 %v558_v49  ;;  %v583_v56 = vand.u32 2147483647, %v558_v49 }
 0x725   :  { %v586_v58 = vor.u32 1.1754944e-38, %v585_v55  ;;  %vm584_vm2 = vcmp.eq.f32.partialorder %v583_v56, 8.507059e+37 }
 0x729   :  { %v1160_v50 = vpop.eup %1159 }
 0x72a   :  { %v575_v51 = vmul.f32 %v1160_v50, %v558_v49  ;;  %vm580_vm14 = vweird.f32 %v1160_v50  ;;  %v168_v49 = vadd.f32 %v1592_v3, %v1462_v35 }
 0x72b   :  { %vm581_vm1 = vmor %vm579_vm15, %vm580_vm14 }
 0x72c   :  { %v576_v52 = vsub.f32 1.0, %v575_v51 }
 0x72e   :  { %v577_v53 = vmul.f32 %v1160_v50, %v576_v52 }
 0x730   :  { %v578_v54 = vadd.f32 %v1160_v50, %v577_v53 }
 0x732   :  { %v582_v57 = vsel %vm581_vm1, %v1160_v50, %v578_v54  ;;  %v127_v54 = vadd.f32 %v1600_v16, %v1466_v41 }
 0x733   :  { %v587_v59 = vsel %vm584_vm2, %v586_v58, %v582_v57 }
 0x77a   :  { %v604_v60 = vpop.permute.xlu2 %603 }
 0x77b   :  { %v606_v62 = vmul.f32 %v604_v60, %v587_v59 }
 0x77d   :  { %1093 = vmatmul.msk.f32.vlgmr.msrb.gmra.mxu0 %vm69_vm0, %v606_v62  ;;  %1094 = vmatmul.msk.f32.vlgmr.msrb.gmra.mxu1 %vm69_vm0, %v606_v62 }
 0x7fa   :  { %v647_v63 = vpop.f32.mrf.mxu1  ;;  %v627_v24 = vpop.f32.mrf.mxu0 }
 0x7fb   :  { %v654_v10 = vadd.f32 %v647_v63, %v165_v7  ;;  %v653_v25 = vadd.f32 %v627_v24, %v124_v22 }
 0x7fd   :  { %1161 = vtanh.f32 %v654_v10  ;;  %v1095_v0 = vmul.f32 -1.442695, %v653_v25  ;;  %v1096_v32 = vmul.f32 -1.442695, %v654_v10 }
 0x7ff   :  { %1163 = vpow2.f32 %v1095_v0 }
 0x803   :  { %v1162_v12 = vpop.eup %1161 }
 0x804   :  { %696 = vrot.lane.b32.xlu0 %v1162_v12, %s1210_s15 }
 0x805   :  { %v1164_v1 = vpop.eup %1163 }
 0x806   :  { %v661_v4 = vadd.f32 1.0, %v1164_v1 }
 0x808   :  { %1165 = vrcp.f32 %v661_v4  ;;  %v674_v15 = vand.u32 2147483648, %v661_v4  ;;  %vm668_vm4 = vweird.f32 %v661_v4  ;;  %v672_v17 = vand.u32 2147483647, %v661_v4 }
 0x80a   :  { %v675_v21 = vor.u32 1.1754944e-38, %v674_v15  ;;  %vm673_vm6 = vcmp.eq.f32.partialorder %v672_v17, 8.507059e+37 }
 0x80e   :  { %v1166_v6 = vpop.eup %1165 }
 0x80f   :  { %v664_v9 = vmul.f32 %v1166_v6, %v661_v4  ;;  %vm669_vm3 = vweird.f32 %v1166_v6 }
 0x810   :  { %vm670_vm5 = vmor %vm668_vm4, %vm669_vm3 }
 0x811   :  { %v665_v8 = vsub.f32 1.0, %v664_v9 }
 0x813   :  { %v666_v11 = vmul.f32 %v1166_v6, %v665_v8 }
 0x815   :  { %v667_v13 = vadd.f32 %v1166_v6, %v666_v11 }
 0x817   :  { %v671_v19 = vsel %vm670_vm5, %v1166_v6, %v667_v13 }
 0x818   :  { %v676_v26 = vsel %vm673_vm6, %v675_v21, %v671_v19 }
 0x819   :  { %v694_v31 = vmul.f32 %v676_v26, %v1584_v45 }
 0x876   :  { %v697_v23 = vpop.permute.xlu0 %696 }
 0x877   :  { %v699_v29 = vmul.f32 %v697_v23, %v676_v26 }
 0x879   :  { %701 = vrot.lane.b32.xlu1 %v699_v29, %s1210_s15 }
 0x8eb   :  { %v702_v27 = vpop.permute.xlu1 %701 }
 0x8ec   :  { %v704_v28 = vadd.f32 %v702_v27, %v694_v31 }
 0x8ee   :  { %1167 = vtanh.f32 %v704_v28 }
 0x8ef   :  { %1169 = vpow2.f32 %v1096_v32 }
 0x8f4   :  { %v1168_v30 = vpop.eup %1167 }
 0x8f5   :  { %707 = vrot.lane.b32.xlu2 %v1168_v30, %s1210_s15  ;;  %v1170_v33 = vpop.eup %1169 }
 0x8f6   :  { %v662_v34 = vadd.f32 1.0, %v1170_v33 }
 0x8f8   :  { %1171 = vrcp.f32 %v662_v34  ;;  %v689_v42 = vand.u32 2147483648, %v662_v34  ;;  %vm683_vm8 = vweird.f32 %v662_v34  ;;  %v687_v43 = vand.u32 2147483647, %v662_v34 }
 0x8fa   :  { %v690_v45 = vor.u32 1.1754944e-38, %v689_v42  ;;  %vm688_vm10 = vcmp.eq.f32.partialorder %v687_v43, 8.507059e+37 }
 0x8fe   :  { %v1172_v36 = vpop.eup %1171 }
 0x8ff   :  { %v679_v37 = vmul.f32 %v1172_v36, %v662_v34  ;;  %vm684_vm7 = vweird.f32 %v1172_v36 }
 0x900   :  { %vm685_vm9 = vmor %vm683_vm8, %vm684_vm7 }
 0x901   :  { %v680_v38 = vsub.f32 1.0, %v679_v37 }
 0x903   :  { %v681_v39 = vmul.f32 %v1172_v36, %v680_v38 }
 0x905   :  { %v682_v40 = vadd.f32 %v1172_v36, %v681_v39 }
 0x907   :  { %v686_v44 = vsel %vm685_vm9, %v1172_v36, %v682_v40  ;;  %v130_v36 = vadd.f32 %v1602_v18, %v1466_v41 }
 0x908   :  { %v691_v46 = vsel %vm688_vm10, %v690_v45, %v686_v44 }
 0x94f   :  { %v708_v47 = vpop.permute.xlu2 %707 }
 0x950   :  { %v710_v48 = vmul.f32 %v708_v47, %v691_v46 }
 0x952   :  { %1097 = vmatmul.msk.f32.vlgmr.msra.gmra.mxu2 %vm69_vm0, %v710_v48  ;;  %1098 = vmatmul.msk.f32.vlgmr.msra.gmra.mxu3 %vm69_vm0, %v710_v48 }
 0x9d5   :  { %v751_v50 = vpop.f32.mrf.mxu3  ;;  %v731_v53 = vpop.f32.mrf.mxu2 }
 0x9d6   :  { %v758_v51 = vadd.f32 %v751_v50, %v168_v49  ;;  %v757_v55 = vadd.f32 %v731_v53, %v127_v54 }
 0x9d8   :  { %1173 = vtanh.f32 %v758_v51  ;;  %v1099_v56 = vmul.f32 -1.442695, %v757_v55  ;;  %v1100_v4 = vmul.f32 -1.442695, %v758_v51 }
 0x9da   :  { %1175 = vpow2.f32 %v1099_v56 }
 0x9de   :  { %v1174_v52 = vpop.eup %1173 }
 0x9df   :  { %800 = vrot.lane.b32.xlu0 %v1174_v52, %s1210_s15 }
 0x9e0   :  { %v1176_v57 = vpop.eup %1175 }
 0x9e1   :  { %v765_v58 = vadd.f32 1.0, %v1176_v57 }
 0x9e3   :  { %1177 = vrcp.f32 %v765_v58  ;;  %v778_v7 = vand.u32 2147483648, %v765_v58  ;;  %vm772_vm12 = vweird.f32 %v765_v58  ;;  %v776_v63 = vand.u32 2147483647, %v765_v58 }
 0x9e5   :  { %v779_v12 = vor.u32 1.1754944e-38, %v778_v7  ;;  %vm777_vm14 = vcmp.eq.f32.partialorder %v776_v63, 8.507059e+37 }
 0x9e9   :  { %v1178_v59 = vpop.eup %1177 }
 0x9ea   :  { %v768_v60 = vmul.f32 %v1178_v59, %v765_v58  ;;  %vm773_vm11 = vweird.f32 %v1178_v59 }
 0x9eb   :  { %vm774_vm13 = vmor %vm772_vm12, %vm773_vm11 }
 0x9ec   :  { %v769_v62 = vsub.f32 1.0, %v768_v60 }
 0x9ee   :  { %v770_v2 = vmul.f32 %v1178_v59, %v769_v62 }
 0x9f0   :  { %v771_v3 = vadd.f32 %v1178_v59, %v770_v2 }
 0x9f2   :  { %v775_v10 = vsel %vm774_vm13, %v1178_v59, %v771_v3 }
 0x9f3   :  { %v780_v16 = vsel %vm777_vm14, %v779_v12, %v775_v10 }
 0x9f4   :  { %v798_v24 = vmul.f32 %v780_v16, %v704_v28  ;;  %v171_v28 = vadd.f32 %v1594_v5, %v1462_v35 }
 0xa51   :  { %v801_v14 = vpop.permute.xlu0 %800 }
 0xa52   :  { %v803_v22 = vmul.f32 %v801_v14, %v780_v16 }
 0xa54   :  { %805 = vrot.lane.b32.xlu1 %v803_v22, %s1210_s15 }
 0xac6   :  { %v806_v25 = vpop.permute.xlu1 %805 }
 0xac7   :  { %v808_v0 = vadd.f32 %v806_v25, %v798_v24  ;;  %v174_v24 = vadd.f32 %v1596_v61, %v1462_v35 }
 0xac9   :  { %1179 = vtanh.f32 %v808_v0 }
 0xaca   :  { %1181 = vpow2.f32 %v1100_v4 }
 0xacf   :  { %v1180_v1 = vpop.eup %1179 }
 0xad0   :  { %811 = vrot.lane.b32.xlu2 %v1180_v1, %s1210_s15  ;;  %v1182_v6 = vpop.eup %1181 }
 0xad1   :  { %v766_v9 = vadd.f32 1.0, %v1182_v6  ;;  %v133_v6 = vadd.f32 %v1604_v20, %v1466_v41 }
 0xad3   :  { %1183 = vrcp.f32 %v766_v9  ;;  %v793_v19 = vand.u32 2147483648, %v766_v9  ;;  %vm787_vm1 = vweird.f32 %v766_v9  ;;  %v791_v21 = vand.u32 2147483647, %v766_v9 }
 0xad5   :  { %v794_v26 = vor.u32 1.1754944e-38, %v793_v19  ;;  %vm792_vm3 = vcmp.eq.f32.partialorder %v791_v21, 8.507059e+37 }
 0xad9   :  { %v1184_v8 = vpop.eup %1183 }
 0xada   :  { %v783_v11 = vmul.f32 %v1184_v8, %v766_v9  ;;  %vm788_vm15 = vweird.f32 %v1184_v8 }
 0xadb   :  { %vm789_vm2 = vmor %vm787_vm1, %vm788_vm15 }
 0xadc   :  { %v784_v13 = vsub.f32 1.0, %v783_v11 }
 0xade   :  { %v785_v15 = vmul.f32 %v1184_v8, %v784_v13 }
 0xae0   :  { %v786_v17 = vadd.f32 %v1184_v8, %v785_v15 }
 0xae2   :  { %v790_v23 = vsel %vm789_vm2, %v1184_v8, %v786_v17 }
 0xae3   :  { %v795_v29 = vsel %vm792_vm3, %v794_v26, %v790_v23 }
 0xb2a   :  { %v812_v31 = vpop.permute.xlu2 %811 }
 0xb2b   :  { %v814_v27 = vmul.f32 %v812_v31, %v795_v29 }
 0xb2d   :  { %1101 = vmatmul.msk.f32.vlgmr.msra.gmra.mxu0 %vm69_vm0, %v814_v27  ;;  %1102 = vmatmul.msk.f32.vlgmr.msra.gmra.mxu1 %vm69_vm0, %v814_v27  ;;  %v1030_v27 = vld [vmem:[%s1676_s4 + $0x38] sm:$0xff] }
 0xb2e   :  { %1046 = vmatpush.msrb.mxu0 %v1030_v27 }
 0xbaa   :  { %v855_v30 = vpop.f32.mrf.mxu1  ;;  %v835_v34 = vpop.f32.mrf.mxu0 }
 0xbab   :  { %v862_v32 = vadd.f32 %v855_v30, %v171_v28  ;;  %v861_v37 = vadd.f32 %v835_v34, %v130_v36  ;;  %v1029_v28 = vld [vmem:[%s1676_s4 + $0x30] sm:$0xff]  ;;  %v1028_v30 = vld [vmem:[%s1676_s4 + $0x28] sm:$0xff] }
 0xbac   :  { %1047 = vmatpush.msrb.mxu0 %v1029_v28  ;;  %v1025_v34 = vld [vmem:[%s1676_s4 + $0x10] sm:$0xff]  ;;  %v1024_v36 = vld [vmem:[%s1676_s4 + $0x8] sm:$0xff] }
 0xbad   :  { %1185 = vtanh.f32 %v862_v32  ;;  %v1103_v38 = vmul.f32 -1.442695, %v861_v37  ;;  %v1104_v56 = vmul.f32 -1.442695, %v862_v32  ;;  %v1027_v32 = vld [vmem:[%s1676_s4 + $0x20] sm:$0xff] }
 0xbae   :  { %1048 = vmatpush.msrb.mxu0 %v1028_v30 }
 0xbaf   :  { %1187 = vpow2.f32 %v1103_v38 }
 0xbb0   :  { %1049 = vmatpush.msrb.mxu0 %v1027_v32 }
 0xbb3   :  { %v1186_v33 = vpop.eup %1185 }
 0xbb4   :  { %904 = vrot.lane.b32.xlu0 %v1186_v33, %s1210_s15  ;;  %v1026_v33 = vld [vmem:[%s1676_s4 + $0x18] sm:$0xff] }
 0xbb5   :  { %v1188_v39 = vpop.eup %1187  ;;  %1050 = vmatpush.msrb.mxu0 %v1026_v33 }
 0xbb6   :  { %v869_v40 = vadd.f32 1.0, %v1188_v39 }
 0xbb7   :  { %1051 = vmatpush.msrb.mxu0 %v1025_v34 }
 0xbb8   :  { %1189 = vrcp.f32 %v869_v40  ;;  %v882_v46 = vand.u32 2147483648, %v869_v40  ;;  %vm876_vm5 = vweird.f32 %v869_v40  ;;  %v880_v47 = vand.u32 2147483647, %v869_v40 }
 0xbb9   :  { %1052 = vmatpush.msrb.mxu0 %v1024_v36 }
 0xbba   :  { %v883_v49 = vor.u32 1.1754944e-38, %v882_v46  ;;  %vm881_vm7 = vcmp.eq.f32.partialorder %v880_v47, 8.507059e+37 }
 0xbbe   :  { %v1190_v42 = vpop.eup %1189 }
 0xbbf   :  { %v872_v43 = vmul.f32 %v1190_v42, %v869_v40  ;;  %vm877_vm4 = vweird.f32 %v1190_v42 }
 0xbc0   :  { %vm878_vm6 = vmor %vm876_vm5, %vm877_vm4 }
 0xbc1   :  { %v873_v44 = vsub.f32 1.0, %v872_v43 }
 0xbc3   :  { %v874_v5 = vmul.f32 %v1190_v42, %v873_v44 }
 0xbc5   :  { %v875_v45 = vadd.f32 %v1190_v42, %v874_v5  ;;  %v1023_v5 = vld [vmem:[%s1676_s4] sm:$0xff] }
 0xbc6   :  { %1053 = vmatpush.msrb.mxu0 %v1023_v5 }
 0xbc7   :  { %v879_v48 = vsel %vm878_vm6, %v1190_v42, %v875_v45 }
 0xbc8   :  { %v884_v50 = vsel %vm881_vm7, %v883_v49, %v879_v48 }
 0xbc9   :  { %v902_v52 = vmul.f32 %v884_v50, %v808_v0 }
 0xc26   :  { %v905_v18 = vpop.permute.xlu0 %904 }
 0xc27   :  { %v907_v51 = vmul.f32 %v905_v18, %v884_v50 }
 0xc29   :  { %909 = vrot.lane.b32.xlu1 %v907_v51, %s1210_s15 }
 0xc9b   :  { %v910_v53 = vpop.permute.xlu1 %909 }
 0xc9c   :  { %v1627_v54 = vadd.f32 %v910_v53, %v902_v52 }
 0xc9e   :  { %1191 = vtanh.f32 %v1627_v54 }
 0xc9f   :  { %1193 = vpow2.f32 %v1104_v56  ;;  %v1112_v56 = vld [vmem:[%s1677_s5] ss:$0 sm:$0xff] }
 0xca4   :  { %v1192_v55 = vpop.eup %1191 }
 0xca5   :  { %915 = vrot.lane.b32.xlu2 %v1192_v55, %s1210_s15  ;;  %v1194_v57 = vpop.eup %1193 }
 0xca6   :  { %v870_v58 = vadd.f32 1.0, %v1194_v57 }
 0xca8   :  { %1195 = vrcp.f32 %v870_v58  ;;  %v897_v7 = vand.u32 2147483648, %v870_v58  ;;  %vm891_vm9 = vweird.f32 %v870_v58  ;;  %v895_v63 = vand.u32 2147483647, %v870_v58 }
 0xcaa   :  { %v898_v12 = vor.u32 1.1754944e-38, %v897_v7  ;;  %vm896_vm11 = vcmp.eq.f32.partialorder %v895_v63, 8.507059e+37 }
 0xcae   :  { %v1196_v59 = vpop.eup %1195 }
 0xcaf   :  { %v887_v60 = vmul.f32 %v1196_v59, %v870_v58  ;;  %vm892_vm8 = vweird.f32 %v1196_v59 }
 0xcb0   :  { %vm893_vm10 = vmor %vm891_vm9, %vm892_vm8 }
 0xcb1   :  { %v888_v62 = vsub.f32 1.0, %v887_v60 }
 0xcb3   :  { %v889_v2 = vmul.f32 %v1196_v59, %v888_v62 }
 0xcb5   :  { %v890_v3 = vadd.f32 %v1196_v59, %v889_v2 }
 0xcb7   :  { %v894_v10 = vsel %vm893_vm10, %v1196_v59, %v890_v3 }
 0xcb8   :  { %v899_v14 = vsel %vm896_vm11, %v898_v12, %v894_v10 }
 0xcff   :  { %v916_v16 = vpop.permute.xlu2 %915 }
 0xd00   :  { %v918_v22 = vmul.f32 %v916_v16, %v899_v14 }
 0xd02   :  { %1105 = vmatmul.msk.f32.vlgmr.msrb.gmra.mxu2 %vm69_vm0, %v918_v22  ;;  %1106 = vmatmul.msk.f32.vlgmr.msrb.gmra.mxu3 %vm69_vm0, %v918_v22 }
 0xd85   :  { %v959_v25 = vpop.f32.mrf.mxu3  ;;  %v939_v4 = vpop.f32.mrf.mxu2 }
 0xd86   :  { %v966_v0 = vadd.f32 %v959_v25, %v174_v24  ;;  %v965_v9 = vadd.f32 %v939_v4, %v133_v6 }
 0xd88   :  { %1197 = vtanh.f32 %v966_v0  ;;  %v1107_v8 = vmul.f32 -1.442695, %v965_v9  ;;  %v1108_v42 = vmul.f32 -1.442695, %v966_v0 }
 0xd8a   :  { %1199 = vpow2.f32 %v1107_v8 }
 0xd8e   :  { %v1198_v1 = vpop.eup %1197 }
 0xd8f   :  { %1008 = vrot.lane.b32.xlu0 %v1198_v1, %s1210_s15 }
 0xd90   :  { %v1200_v11 = vpop.eup %1199 }
 0xd91   :  { %v973_v13 = vadd.f32 1.0, %v1200_v11 }
 0xd93   :  { %1201 = vrcp.f32 %v973_v13  ;;  %v986_v21 = vand.u32 2147483648, %v973_v13  ;;  %vm980_vm13 = vweird.f32 %v973_v13  ;;  %v984_v23 = vand.u32 2147483647, %v973_v13 }
 0xd95   :  { %v987_v29 = vor.u32 1.1754944e-38, %v986_v21  ;;  %vm985_vm15 = vcmp.eq.f32.partialorder %v984_v23, 8.507059e+37 }
 0xd99   :  { %v1202_v15 = vpop.eup %1201 }
 0xd9a   :  { %v976_v17 = vmul.f32 %v1202_v15, %v973_v13  ;;  %vm981_vm12 = vweird.f32 %v1202_v15 }
 0xd9b   :  { %vm982_vm14 = vmor %vm980_vm13, %vm981_vm12 }
 0xd9c   :  { %v977_v19 = vsub.f32 1.0, %v976_v17 }
 0xd9e   :  { %v978_v35 = vmul.f32 %v1202_v15, %v977_v19 }
 0xda0   :  { %v979_v61 = vadd.f32 %v1202_v15, %v978_v35 }
 0xda2   :  { %v983_v26 = vsel %vm982_vm14, %v1202_v15, %v979_v61 }
 0xda3   :  { %v988_v20 = vsel %vm985_vm15, %v987_v29, %v983_v26 }
 0xda4   :  { %v1006_v37 = vmul.f32 %v988_v20, %v1627_v54 }
 0xe01   :  { %v1009_v41 = vpop.permute.xlu0 %1008 }
 0xe02   :  { %v1011_v31 = vmul.f32 %v1009_v41, %v988_v20 }
 0xe04   :  { %1013 = vrot.lane.b32.xlu1 %v1011_v31, %s1210_s15 }
 0xe76   :  { %v1014_v38 = vpop.permute.xlu1 %1013 }
 0xe77   :  { %v1016_v39 = vadd.f32 %v1014_v38, %v1006_v37 }
 0xe79   :  { %1203 = vtanh.f32 %v1016_v39 }
 0xe7a   :  { %1205 = vpow2.f32 %v1108_v42 }
 0xe7f   :  { %v1204_v40 = vpop.eup %1203 }
 0xe80   :  { %1019 = vrot.lane.b32.xlu2 %v1204_v40, %s1210_s15  ;;  %v1206_v43 = vpop.eup %1205 }
 0xe81   :  { %v974_v44 = vadd.f32 1.0, %v1206_v43 }
 0xe83   :  { %1207 = vrcp.f32 %v974_v44  ;;  %v1001_v18 = vand.u32 2147483648, %v974_v44  ;;  %vm995_vm2 = vweird.f32 %v974_v44  ;;  %v999_v50 = vand.u32 2147483647, %v974_v44 }
 0xe85   :  { %v1002_v52 = vor.u32 1.1754944e-38, %v1001_v18  ;;  %vm1000_vm4 = vcmp.eq.f32.partialorder %v999_v50, 8.507059e+37 }
 0xe89   :  { %v1208_v45 = vpop.eup %1207 }
 0xe8a   :  { %v991_v46 = vmul.f32 %v1208_v45, %v974_v44  ;;  %vm996_vm1 = vweird.f32 %v1208_v45 }
 0xe8b   :  { %vm997_vm3 = vmor %vm995_vm2, %vm996_vm1 }
 0xe8c   :  { %v992_v47 = vsub.f32 1.0, %v991_v46 }
 0xe8e   :  { %v993_v48 = vmul.f32 %v1208_v45, %v992_v47 }
 0xe90   :  { %v994_v49 = vadd.f32 %v1208_v45, %v993_v48 }
 0xe92   :  { %v998_v51 = vsel %vm997_vm3, %v1208_v45, %v994_v49 }
 0xe93   :  { %v1003_v53 = vsel %vm1000_vm4, %v1002_v52, %v998_v51 }
 0xeda   :  { %v1020_v54 = vpop.permute.xlu2 %1019 }
 0xedb   :  { %v1022_v55 = vmul.f32 %v1020_v54, %v1003_v53 }
 0xedd   :  { %1109 = vmatmul.msk.f32.vlgmr.msrb.gmra.mxu0 %vm69_vm0, %v1022_v55 }
 0xf5a   :  { %v1055_v57 = vpop.f32.mrf.mxu0 }
 0xf5b   :  { %v1056_v58 = vadd.f32 %v1112_v56, %v1055_v57 }
 0xf5d   :  { %1058 = vst [vmem:[%s1678_s6] sm:$0xff] %v1056_v58 }

</bundles_post_ra>
